<compile_context>
chip_gen: v7x
topology: tpu7x:2x2x1
jax: 0.10.0
libtpu: 0.0.40
codegen_flags: <defaults>
</compile_context>

<pallas_src>
import jax
import jax.numpy as jnp
from jax import lax
from jax.experimental import pallas as pl
from jax.experimental.pallas import tpu as pltpu

VIRTUAL_ATOM_FEATURE_PLACEHOLDER = -1  # as used in PerioGT


def _round_up(x, m):
    return (x + m - 1) // m * m


def _atom_embedding_kernel(ind_ref, x_ref, w2_ref, b_ref, virt_ref, o_ref):
    # ind_ref  : [tile_n, 1]        int32 raw indicators
    # x_ref    : [tile_n, 2*d_in]   bf16/f32, lanes [0:d_in)=node0, [d_in:2*d_in)=node1 (UNPADDED)
    # w2_ref   : [2*d_in, d_g_pad]  f32  vstack([W, W])        (resident, constant index_map)
    # b_ref    : [1, d_g_pad]       f32                        (resident)
    # virt_ref : [1, d_g_pad]       f32                        (resident)
    # o_ref    : [tile_n, d_g_pad]
    d_in = x_ref.shape[1] // 2

    # 1.0 on virtual rows (indicator == PLACEHOLDER).  Garbage values in the ragged tail
    # block only affect their own (discarded) output rows.
    mask = (ind_ref[...] == VIRTUAL_ATOM_FEATURE_PLACEHOLDER).astype(jnp.float32)  # [tile_n, 1]

    # Upcast to f32 for the VPU combine (v5e has no bf16 VALU); zero the node-1 half of the
    # lane axis on virtual rows, then a single MXU pass over K = 2*d_in.
    x = x_ref[...].astype(jnp.float32)                          # [tile_n, 2*d_in]
    col = lax.broadcasted_iota(jnp.int32, x.shape, 1)
    keep = jnp.where(col < d_in, 1.0, 1.0 - mask)               # [tile_n, 2*d_in]
    h = jnp.dot(x * keep, w2_ref[...], preferred_element_type=jnp.float32)

    # Bias: non-virtual rows -> 2*b ; virtual rows -> b + virt  (exactly matches reference).
    b = b_ref[...]                                              # [1, d_g_pad]
    bias = 2.0 * b + mask * (virt_ref[...] - b)                 # [tile_n, d_g_pad]

    # TODO(synk): training-mode dropout (scaled Bernoulli mask) not implemented; eval-mode
    # dropout is the identity, which is what is reproduced here.
    o_ref[...] = (h + bias).astype(o_ref.dtype)


def atom_embedding(pair_node_feats, indicators, w, b, virt_emb, *, tile_n=512, out_dtype=None):
    """pair_node_feats: [N, 2, d_in] (bf16 recommended; f32 accepted); indicators: [N] int.
    w: [d_in, d_g] (== torch Linear.weight.T), b: [d_g], virt_emb: [d_g]."""
    N, two, d_in = pair_node_feats.shape
    assert two == 2
    d_g = w.shape[1]
    if out_dtype is None:
        out_dtype = pair_node_feats.dtype   # bf16 in -> bf16 out halves the writeback stream

    # Big activation stream: contiguous, UNPADDED [N, 2*d_in] view (free reshape, no HBM pad
    # pass), kept in whatever (narrow) dtype the caller stores it in.
    x = pair_node_feats.reshape(N, 2 * d_in)
    ind = indicators.reshape(N, 1).astype(jnp.int32)

    # Resident (read-once) parameters: cheap to pad / duplicate to lane-aligned widths.
    d_g_pad = _round_up(d_g, 128)
    w_p = jnp.pad(w.astype(jnp.float32), ((0, 0), (0, d_g_pad - d_g)))
    w2 = jnp.concatenate([w_p, w_p], axis=0)                                   # [2*d_in, d_g_pad]
    b_p = jnp.pad(b.astype(jnp.float32), (0, d_g_pad - d_g)).reshape(1, d_g_pad)
    v_p = jnp.pad(virt_emb.astype(jnp.float32), (0, d_g_pad - d_g)).reshape(1, d_g_pad)

    # Keep >= 2 grid steps when possible so v7x's two TensorCores both get work on the
    # 'parallel' axis; no-op for production-sized N.
    if N > 8:
        tile_n = min(tile_n, _round_up(pl.cdiv(N, 2), 8))
    tile_n = max(tile_n, 8)

    grid = (pl.cdiv(N, tile_n),)
    out = pl.pallas_call(
        _atom_embedding_kernel,
        out_shape=jax.ShapeDtypeStruct((N, d_g_pad), out_dtype),
        grid_spec=pltpu.PrefetchScalarGridSpec(
            num_scalar_prefetch=0,
            grid=grid,
            in_specs=[
                pl.BlockSpec((tile_n, 1), lambda i: (i, 0)),            # indicators (int32)
                pl.BlockSpec((tile_n, 2 * d_in), lambda i: (i, 0)),     # packed pair feats
                pl.BlockSpec((2 * d_in, d_g_pad), lambda i: (0, 0)),    # W2 (resident)
                pl.BlockSpec((1, d_g_pad), lambda i: (0, 0)),           # bias (resident)
                pl.BlockSpec((1, d_g_pad), lambda i: (0, 0)),           # virtual emb (resident)
            ],
            out_specs=pl.BlockSpec((tile_n, d_g_pad), lambda i: (i, 0)),
        ),
        compiler_params=pltpu.CompilerParams(
            dimension_semantics=("parallel",)),
    )(ind, x, w2, b_p, v_p)

    # Ragged-tail rows never exist in the output (out_shape rows == N, OOB stores dropped);
    # only slice off lane padding if d_g was not already a multiple of 128.
    return out if d_g_pad == d_g else out[:, :d_g]


def _reference(pair_node_feats_f32, indicators, w, b, virt_emb):
    h = jnp.einsum("npd,dg->npg", pair_node_feats_f32, w) + b          # [N, 2, d_g]
    mask = (indicators == VIRTUAL_ATOM_FEATURE_PLACEHOLDER)[:, None]
    h1 = jnp.where(mask, virt_emb[None, :], h[:, 1, :])
    return h[:, 0, :] + h1


if __name__ == "__main__":
    key = jax.random.PRNGKey(0)
    # Module defaults: d_node_feats=40, d_g_feats=128.  N chosen non-multiple of tile_n to
    # exercise the ragged-tail path and give a 2-step grid (both v7x TCs).
    N, d_atom_feats, d_g_feats = 1000, 40, 128

    k1, k2, k3, k4, k5 = jax.random.split(key, 5)
    # Activation stream stored in bf16 -> halves the dominant HBM read.
    pair_node_feats = jax.random.normal(k1, (N, 2, d_atom_feats), dtype=jnp.bfloat16)
    # roughly half the rows are "virtual" (indicator == placeholder)
    indicators = jnp.where(
        jax.random.bernoulli(k2, 0.5, (N,)),
        jnp.full((N,), VIRTUAL_ATOM_FEATURE_PLACEHOLDER, jnp.int32),
        jnp.zeros((N,), jnp.int32),
    )

    # Deterministic "parameters": Linear(d_atom_feats, d_g_feats) + Embedding(1, d_g_feats)
    w = jax.random.normal(k3, (d_atom_feats, d_g_feats), dtype=jnp.float32) * 0.02
    b = jax.random.normal(k4, (d_g_feats,), dtype=jnp.float32) * 0.02
    virt_emb = jax.random.normal(k5, (d_g_feats,), dtype=jnp.float32) * 0.02

    out = atom_embedding(pair_node_feats, indicators, w, b, virt_emb)   # bf16 in -> bf16 out
    out = jax.block_until_ready(out)

    ref = _reference(pair_node_feats.astype(jnp.float32), indicators, w, b, virt_emb)
    assert out.shape == (N, d_g_feats)
    assert jnp.allclose(out.astype(jnp.float32), ref, atol=3e-2, rtol=3e-2), "mismatch vs reference"

    print("KERNEL_OK")
</pallas_src>

<mosaic_0001>
module attributes {stable_mosaic.version = 11 : i64} {
  func.func @_atom_embedding_kernel(%arg0: i32, %arg1: memref<504x1xi32, #tpu.memory_space<vmem>>, %arg2: memref<504x80xbf16, #tpu.memory_space<vmem>>, %arg3: memref<80x128xf32, #tpu.memory_space<vmem>>, %arg4: memref<1x128xf32, #tpu.memory_space<vmem>>, %arg5: memref<1x128xf32, #tpu.memory_space<vmem>>, %arg6: memref<504x128xbf16, #tpu.memory_space<vmem>>) attributes {dimension_semantics = [#tpu.dimension_semantics<parallel>], iteration_bounds = array<i64: 2>, scalar_prefetch = 0 : i64, scratch_operands = 0 : i64, tpu.core_type = #tpu.core_type<tc>, window_params = [{transform_indices = @transform_0, window_bounds = array<i64: 504, 1>}, {transform_indices = @transform_1, window_bounds = array<i64: 504, 80>}, {pipeline_mode = #tpu.pipeline_mode<synchronous>, transform_indices = @transform_2, window_bounds = array<i64: 80, 128>}, {pipeline_mode = #tpu.pipeline_mode<synchronous>, transform_indices = @transform_3, window_bounds = array<i64: 1, 128>}, {pipeline_mode = #tpu.pipeline_mode<synchronous>, transform_indices = @transform_4, window_bounds = array<i64: 1, 128>}, {transform_indices = @transform_5, window_bounds = array<i64: 504, 128>}]} {
    %c0 = arith.constant 0 : index
    %c0_0 = arith.constant 0 : index
    %0 = vector.load %arg1[%c0, %c0_0] : memref<504x1xi32, #tpu.memory_space<vmem>>, vector<504x1xi32>
    %c-1_i32 = arith.constant -1 : i32
    %1 = vector.broadcast %c-1_i32 : i32 to vector<504x1xi32>
    %2 = arith.cmpi eq, %0, %1 : vector<504x1xi32>
    %3 = arith.extui %2 : vector<504x1xi1> to vector<504x1xi32>
    %4 = arith.sitofp %3 : vector<504x1xi32> to vector<504x1xf32>
    %c0_1 = arith.constant 0 : index
    %c0_2 = arith.constant 0 : index
    %5 = vector.load %arg2[%c0_1, %c0_2] : memref<504x80xbf16, #tpu.memory_space<vmem>>, vector<504x80xbf16>
    %6 = arith.extf %5 : vector<504x80xbf16> to vector<504x80xf32>
    %7 = tpu.iota {dimensions = array<i32: 1>} : vector<504x80xi32>
    %c40_i32 = arith.constant 40 : i32
    %8 = vector.broadcast %c40_i32 : i32 to vector<504x80xi32>
    %9 = arith.cmpi slt, %7, %8 : vector<504x80xi32>
    %cst = arith.constant 1.000000e+00 : f32
    %10 = vector.broadcast %cst : f32 to vector<504x1xf32>
    %11 = arith.subf %10, %4 : vector<504x1xf32>
    %cst_3 = arith.constant 1.000000e+00 : f32
    %12 = vector.broadcast %cst_3 : f32 to vector<504x80xf32>
    %13 = vector.shape_cast %11 : vector<504x1xf32> to vector<504x1xf32>
    %14 = vector.broadcast %13 : vector<504x1xf32> to vector<504x80xf32>
    %15 = arith.select %9, %12, %14 : vector<504x80xi1>, vector<504x80xf32>
    %16 = arith.mulf %6, %15 : vector<504x80xf32>
    %c0_4 = arith.constant 0 : index
    %c0_5 = arith.constant 0 : index
    %17 = vector.load %arg3[%c0_4, %c0_5] : memref<80x128xf32, #tpu.memory_space<vmem>>, vector<80x128xf32>
    %cst_6 = arith.constant dense<0.000000e+00> : vector<504x128xf32>
    %18 = tpu.matmul %16, %17, %cst_6 {dimension_numbers = #tpu.dot_dimension_numbers<[1], [0], [0], [1], [0, 0, 1, 1], [], []>} : vector<504x80xf32>, vector<80x128xf32>, vector<504x128xf32> -> vector<504x128xf32>
    %c0_7 = arith.constant 0 : index
    %c0_8 = arith.constant 0 : index
    %19 = vector.load %arg4[%c0_7, %c0_8] : memref<1x128xf32, #tpu.memory_space<vmem>>, vector<1x128xf32>
    %cst_9 = arith.constant 2.000000e+00 : f32
    %20 = vector.broadcast %cst_9 : f32 to vector<1x128xf32>
    %21 = arith.mulf %20, %19 : vector<1x128xf32>
    %c0_10 = arith.constant 0 : index
    %c0_11 = arith.constant 0 : index
    %22 = vector.load %arg5[%c0_10, %c0_11] : memref<1x128xf32, #tpu.memory_space<vmem>>, vector<1x128xf32>
    %23 = arith.subf %22, %19 : vector<1x128xf32>
    %24 = vector.broadcast %4 : vector<504x1xf32> to vector<504x128xf32>
    %25 = vector.broadcast %23 : vector<1x128xf32> to vector<504x128xf32>
    %26 = arith.mulf %24, %25 : vector<504x128xf32>
    %27 = vector.broadcast %21 : vector<1x128xf32> to vector<504x128xf32>
    %28 = arith.addf %27, %26 : vector<504x128xf32>
    %29 = arith.addf %18, %28 : vector<504x128xf32>
    %30 = arith.truncf %29 : vector<504x128xf32> to vector<504x128xbf16>
    %c0_12 = arith.constant 0 : index
    %c0_13 = arith.constant 0 : index
    %31 = vector.load %arg6[%c0_12, %c0_13] : memref<504x128xbf16, #tpu.memory_space<vmem>>, vector<504x128xbf16>
    tpu.vector_store %arg6[%c0_12, %c0_13], %30 {strides = array<i32>} : memref<504x128xbf16, #tpu.memory_space<vmem>>, vector<504x128xbf16>,
    return
  }
  func.func @transform_0(%arg0: i32) -> (i32, i32) {
    %c0_i32 = arith.constant 0 : i32
    %c0_i32_0 = arith.constant 0 : i32
    return %arg0, %c0_i32 : i32, i32
  }
  func.func @transform_1(%arg0: i32) -> (i32, i32) {
    %c0_i32 = arith.constant 0 : i32
    %c0_i32_0 = arith.constant 0 : i32
    return %arg0, %c0_i32 : i32, i32
  }
  func.func @transform_2(%arg0: i32) -> (i32, i32) {
    %c0_i32 = arith.constant 0 : i32
    %c0_i32_0 = arith.constant 0 : i32
    %c0_i32_1 = arith.constant 0 : i32
    return %c0_i32, %c0_i32_0 : i32, i32
  }
  func.func @transform_3(%arg0: i32) -> (i32, i32) {
    %c0_i32 = arith.constant 0 : i32
    %c0_i32_0 = arith.constant 0 : i32
    %c0_i32_1 = arith.constant 0 : i32
    return %c0_i32, %c0_i32_0 : i32, i32
  }
  func.func @transform_4(%arg0: i32) -> (i32, i32) {
    %c0_i32 = arith.constant 0 : i32
    %c0_i32_0 = arith.constant 0 : i32
    %c0_i32_1 = arith.constant 0 : i32
    return %c0_i32, %c0_i32_0 : i32, i32
  }
  func.func @transform_5(%arg0: i32) -> (i32, i32) {
    %c0_i32 = arith.constant 0 : i32
    %c0_i32_0 = arith.constant 0 : i32
    return %arg0, %c0_i32 : i32, i32
  }
}

</mosaic_0001>

<bundles_post_ra>
// kernel: tpu_custom_call.1
= control target key start
LH: loop header
LB: loop body
LE: loop exit
PB: predicated region body
PF: predicated region fallthrough
CT: control target
= control target key end

     0   :  { %10 = vsyncpa [#allocation3], 0  ;;  %s5276_s0 = inlined_call_operand.vmem [shape: s32[1000,1], index: 0, kind: input, shape index: {}]   ;;  %s5277_s1 = inlined_call_operand.vmem [shape: bf16[1000,80], index: 1, kind: input, shape index: {}]   ;;  %s5278_s2 = inlined_call_operand.vmem [shape: f32[80,128], index: 2, kind: input, shape index: {}]   ;;  %s5279_s3 = inlined_call_operand.vmem [shape: f32[1,128], index: 3, kind: input, shape index: {}]   ;;  %s5280_s4 = inlined_call_operand.vmem [shape: f32[1,128], index: 4, kind: input, shape index: {}]   ;;  %s5281_s5 = inlined_call_operand.hbm [shape: bf16[1000,128], index: 5, kind: output, shape index: {}]  }
   0x1   :  { %12 = vsyncpa [#allocation3 + $0x1], 0  ;;  %s3839_s18 = smov 0   ;;  %s3841_s19 = smov 0  }
   0x2   :  { %s3843_s20 = smov 0   ;;  %s3845_s21 = smov 0  }
   0x3 LB: > { %s3860_s22 = sadd.s32 4294967295, %s3800_s21   ;;  %s2624_s23 = sadd.s32 4294967294, %s3800_s21   ;;  %s3800_s21 = sphi %s3845_s21, %s5371_s21   ;;  %s3796_s20 = sphi %s3843_s20, %s5370_s20   ;;  %s3792_s19 = sphi %s3841_s19, %s5369_s19   ;;  %s3788_s18 = sphi %s3839_s18, %s5368_s18  }
   0x4   : > { %s3864_s24 = sadd.s32 1, %s3800_s21   ;;  %s140_s25 = sadd.s32 1, %s3796_s20 }
   0x5   : > { %s137_s26 = ssub.s32 %s3800_s21, %s3864_s24  ;;  %p150_p0 = scmp.ne.s32.totalorder %s3796_s20, %s3792_s19 }
   0x6   : > { %p138_p1 = scmp.eq.s32.totalorder %s137_s26, 0  ;;  %p151_p2 = scmp.eq.s32.totalorder %s3860_s22, 1 }
   0x7   : > { %p156_p3 = scmp.ne.s32.totalorder %s3792_s19, %s3788_s18  ;;  %p157_p4 = scmp.eq.s32.totalorder %s2624_s23, 1 }
   0x8   : > { %s3875_s27 = scalar_select %p138_p1, %s3796_s20, %s140_s25  }
   0x9   : > { %p3877_p5 = por %p151_p2, %p150_p0  ;;  %p3881_p6 = por %p157_p4, %p156_p3 }
   0xa   : > { %p2627_p7 = scmp.ge.s32.totalorder %s3800_s21, 1  ;;  %p218_p8 = scmp.lt.s32.totalorder %s3800_s21, 3 }
   0xc   : > { %p219_p9 = pnand %p2627_p7, %p218_p8 }
   0xe   : > { %222 = sbr.rel (%p219_p9) target bundleno = 578 (0x242), region = 40 }
  0x15   : > { %s3888_s30 = smul.u32 63, %s3860_s22  ;;  %v1177_v0 = vld [vmem:[%s5278_s2] sm:$0xff]  ;;  %v1178_v1 = vld [vmem:[%s5278_s2 + $0x8] sm:$0xff]  ;;  %v3802_v2 = vmov 0   ;;  %v1179_v4 = vld [vmem:[%s5278_s2 + $0x10] sm:$0xff]  ;;  %v3803_v6 = vmov 0.0|0.0  }
  0x16   : > { %3582 = vset.pattern.permute.xlu1 %v3802_v2  ;;  %3581 = vset.pattern.permute.xlu0 %v3802_v2  ;;  %v3512_v3 = vpack.c.bf16 %v1178_v1, %v1177_v0  ;;  %v1180_v5 = vld [vmem:[%s5278_s2 + $0x18] sm:$0xff]  ;;  %v1181_v8 = vld [vmem:[%s5278_s2 + $0x20] sm:$0xff]  ;;  %v1182_v9 = vld [vmem:[%s5278_s2 + $0x28] sm:$0xff]  ;;  %v5282_v19 = vmov 0.0  }
  0x17   : > { %p264_p10 = scmp.lt.s32.totalorder %s3888_s30, 124  ;;  %3511 = vmatprep.subr.bf16.mxu0 %v3803_v6  ;;  %3526 = vmatprep.subr.bf16.mxu1 %v3803_v6  ;;  %v3515_v7 = vpack.c.bf16 %v1180_v5, %v1179_v4  ;;  %v1183_v10 = vld [vmem:[%s5278_s2 + $0x30] sm:$0xff]  ;;  %v1184_v11 = vld [vmem:[%s5278_s2 + $0x38] sm:$0xff]  ;;  %v3518_v12 = vpack.c.bf16 %v1182_v9, %v1181_v8  ;;  %s2539_s13 = ssub.s32 (%p3877_p5), 125, %s3888_s30 }
  0x18   : > { %3513 = vmatpush3.bf16.msra.mxu0 %v3512_v3  ;;  %3531 = vmatpush3.bf16.msra.mxu1 %v3512_v3  ;;  %v3521_v18 = vpack.c.bf16 %v1184_v11, %v1183_v10  ;;  %p2540_p11 = scmp.lt.s32.totalorder (%p3877_p5), %s2539_s13, 63 }
  0x19   : > { %s3904_s14 = scalar_select %p264_p10, %s3888_s30, 124  ;;  %3514 = vmatprep.subr.bf16.mxu0 %v3803_v6  ;;  %3527 = vmatprep.subr.bf16.mxu1 %v3803_v6 }
  0x1b   : > { %s2628_s25 = sshll.u32 %s3904_s14, 3  ;;  %s2629_s17 = sshll.u32 %s3904_s14, 2 }
  0x1c   : > { %s3922_s11 = scalar_lea.vmem %s5276_s0, %s2628_s25  ;;  %3516 = vmatpush3.bf16.msra.mxu0 %v3515_v7  ;;  %3532 = vmatpush3.bf16.msra.mxu1 %v3515_v7  ;;  %s4333_s26 = scalar_lea.vmem %s5277_s1, %s2629_s17 }
  0x1d   : > { %v294_v13 = vld [vmem:[%s3922_s11 + $0x10] sm:$0xff]  ;;  %v295_v14 = vld [vmem:[%s3922_s11 + $0x18] sm:$0xff]  ;;  %v292_v15 = vld [vmem:[%s3922_s11] sm:$0xff]  ;;  %3517 = vmatprep.subr.bf16.mxu0 %v3803_v6  ;;  %3528 = vmatprep.subr.bf16.mxu1 %v3803_v6  ;;  %s256_s14 = sand.u32 1, %s3792_s19  }
  0x1e   : > { %vm357_vm0 = vcmp.eq.s32.totalorder %v294_v13, 4294967295  ;;  %vm358_vm1 = vcmp.eq.s32.totalorder %v295_v14, 4294967295  ;;  %v293_v16 = vld [vmem:[%s3922_s11 + $0x8] sm:$0xff]  ;;  %vm355_vm2 = vcmp.eq.s32.totalorder %v292_v15, 4294967295  ;;  %v296_v23 = vld [vmem:[%s3922_s11 + $0x20] sm:$0xff]  ;;  %v299_v29 = vld [vmem:[%s3922_s11 + $0x38] sm:$0xff] }
  0x1f   : > { %v297_v17 = vld [vmem:[%s3922_s11 + $0x28] sm:$0xff]  ;;  %v3930_v20 = vsel %vm357_vm0, 1.0, %v5282_v19  ;;  %v3933_v21 = vsel %vm358_vm1, 1.0, %v5282_v19  ;;  %vm356_vm3 = vcmp.eq.s32.totalorder %v293_v16, 4294967295  ;;  %v3936_v22 = vsel %vm355_vm2, 1.0, %v5282_v19  ;;  %v298_v30 = vld [vmem:[%s3922_s11 + $0x30] sm:$0xff] }
  0x20   : > { %v675_v25 = vsub.f32 1.0, %v3930_v20  ;;  %v3943_v26 = vsel %vm356_vm3, 1.0, %v5282_v19  ;;  %v673_v27 = vsub.f32 1.0, %v3936_v22  ;;  %3519 = vmatpush3.bf16.msra.mxu0 %v3518_v12  ;;  %3533 = vmatpush3.bf16.msra.mxu1 %v3518_v12  ;;  %vm360_vm4 = vcmp.eq.s32.totalorder %v297_v17, 4294967295  ;;  %v301_v35 = vld [vmem:[%s3922_s11 + $0x48] sm:$0xff]  ;;  %v300_v36 = vld [vmem:[%s3922_s11 + $0x40] sm:$0xff] }
  0x21   : > { %3520 = vmatprep.subr.bf16.mxu0 %v3803_v6  ;;  %3529 = vmatprep.subr.bf16.mxu1 %v3803_v6  ;;  %v676_v31 = vsub.f32 1.0, %v3933_v21  ;;  %v674_v32 = vsub.f32 1.0, %v3943_v26  ;;  %vm359_vm5 = vcmp.eq.s32.totalorder %v296_v23, 4294967295  ;;  %v3953_v33 = vsel %vm360_vm4, 1.0, %v5282_v19  ;;  %v303_v41 = vld [vmem:[%s3922_s11 + $0x58] sm:$0xff]  ;;  %v302_v42 = vld [vmem:[%s3922_s11 + $0x50] sm:$0xff] }
  0x22   : > { %748 = vperm.xlu1 %3582, %v675_v25   ;;  %738 = vperm.xlu0 %3581, %v673_v27   ;;  %v3956_v34 = vsel %vm359_vm5, 1.0, %v5282_v19  ;;  %vm362_vm6 = vcmp.eq.s32.totalorder %v299_v29, 4294967295  ;;  %vm361_vm7 = vcmp.eq.s32.totalorder %v298_v30, 4294967295  ;;  %v678_v37 = vsub.f32 1.0, %v3953_v33  ;;  %v305_v47 = vld [vmem:[%s3922_s11 + $0x68] sm:$0xff]  ;;  %v304_v48 = vld [vmem:[%s3922_s11 + $0x60] sm:$0xff] }
  0x23   : > { %v677_v38 = vsub.f32 1.0, %v3956_v34  ;;  %v3963_v39 = vsel %vm362_vm6, 1.0, %v5282_v19  ;;  %v3966_v40 = vsel %vm361_vm7, 1.0, %v5282_v19  ;;  %vm364_vm8 = vcmp.eq.s32.totalorder %v301_v35, 4294967295  ;;  %v307_v53 = vld [vmem:[%s3922_s11 + $0x78] sm:$0xff]  ;;  %v306_v54 = vld [vmem:[%s3922_s11 + $0x70] sm:$0xff] }
  0x24   : > { %3522 = vmatpush3.bf16.msra.mxu0 %v3521_v18  ;;  %3534 = vmatpush3.bf16.msra.mxu1 %v3521_v18  ;;  %vm363_vm9 = vcmp.eq.s32.totalorder %v300_v36, 4294967295  ;;  %v680_v43 = vsub.f32 1.0, %v3963_v39  ;;  %v679_v44 = vsub.f32 1.0, %v3966_v40  ;;  %v3973_v45 = vsel %vm364_vm8, 1.0, %v5282_v19  ;;  %v309_v59 = vld [vmem:[%s3922_s11 + $0x88] sm:$0xff]  ;;  %v308_v60 = vld [vmem:[%s3922_s11 + $0x80] sm:$0xff] }
  0x25   : > { %3523 = vmatprep.subr.bf16.mxu0 %v3803_v6  ;;  %3530 = vmatprep.subr.bf16.mxu1 %v3803_v6  ;;  %v3976_v46 = vsel %vm363_vm9, 1.0, %v5282_v19  ;;  %vm366_vm10 = vcmp.eq.s32.totalorder %v303_v41, 4294967295  ;;  %vm365_vm11 = vcmp.eq.s32.totalorder %v302_v42, 4294967295  ;;  %v682_v49 = vsub.f32 1.0, %v3973_v45  ;;  %v311_v1 = vld [vmem:[%s3922_s11 + $0x98] sm:$0xff]  ;;  %v310_v2 = vld [vmem:[%s3922_s11 + $0x90] sm:$0xff] }
  0x26   : > { %753 = vperm.xlu1 %3582, %v676_v31   ;;  %743 = vperm.xlu0 %3581, %v674_v32   ;;  %v681_v50 = vsub.f32 1.0, %v3976_v46  ;;  %v3983_v51 = vsel %vm366_vm10, 1.0, %v5282_v19  ;;  %v3986_v52 = vsel %vm365_vm11, 1.0, %v5282_v19  ;;  %vm368_vm12 = vcmp.eq.s32.totalorder %v305_v47, 4294967295  ;;  %v313_v7 = vld [vmem:[%s3922_s11 + $0xa8] sm:$0xff]  ;;  %v312_v8 = vld [vmem:[%s3922_s11 + $0xa0] sm:$0xff] }
  0x27   : > { %vm367_vm13 = vcmp.eq.s32.totalorder %v304_v48, 4294967295  ;;  %v684_v55 = vsub.f32 1.0, %v3983_v51  ;;  %v683_v56 = vsub.f32 1.0, %v3986_v52  ;;  %v3993_v57 = vsel %vm368_vm12, 1.0, %v5282_v19  ;;  %v315_v13 = vld [vmem:[%s3922_s11 + $0xb8] sm:$0xff]  ;;  %v314_v14 = vld [vmem:[%s3922_s11 + $0xb0] sm:$0xff] }
  0x28   : > { %v3996_v58 = vsel %vm367_vm13, 1.0, %v5282_v19  ;;  %vm370_vm14 = vcmp.eq.s32.totalorder %v307_v53, 4294967295  ;;  %vm369_vm15 = vcmp.eq.s32.totalorder %v306_v54, 4294967295  ;;  %v686_v61 = vsub.f32 1.0, %v3993_v57  ;;  %v324_v15 = vld [vmem:[%s3922_s11 + $0x100] sm:$0xff]  ;;  %v326_v23 = vld [vmem:[%s3922_s11 + $0x110] sm:$0xff] }
  0x29   : > { %v685_v62 = vsub.f32 1.0, %v3996_v58  ;;  %v4003_v63 = vsel %vm370_vm14, 1.0, %v5282_v19  ;;  %v4006_v0 = vsel %vm369_vm15, 1.0, %v5282_v19  ;;  %vm372_vm0 = vcmp.eq.s32.totalorder %v309_v59, 4294967295  ;;  %v316_v16 = vld [vmem:[%s3922_s11 + $0xc0] sm:$0xff]  ;;  %v325_v25 = vld [vmem:[%s3922_s11 + $0x108] sm:$0xff] }
  0x2a   : > { %763 = vperm.xlu1 %3582, %v678_v37   ;;  %758 = vperm.xlu0 %3581, %v677_v38   ;;  %vm371_vm1 = vcmp.eq.s32.totalorder %v308_v60, 4294967295  ;;  %v688_v3 = vsub.f32 1.0, %v4003_v63  ;;  %v687_v4 = vsub.f32 1.0, %v4006_v0  ;;  %v4013_v5 = vsel %vm372_vm0, 1.0, %v5282_v19  ;;  %v328_v27 = vld [vmem:[%s3922_s11 + $0x120] sm:$0xff]  ;;  %v327_v31 = vld [vmem:[%s3922_s11 + $0x118] sm:$0xff] }
  0x2b   : > { %v4016_v6 = vsel %vm371_vm1, 1.0, %v5282_v19  ;;  %vm374_vm2 = vcmp.eq.s32.totalorder %v311_v1, 4294967295  ;;  %vm373_vm3 = vcmp.eq.s32.totalorder %v310_v2, 4294967295  ;;  %v690_v9 = vsub.f32 1.0, %v4013_v5  ;;  %v330_v32 = vld [vmem:[%s3922_s11 + $0x130] sm:$0xff]  ;;  %v329_v35 = vld [vmem:[%s3922_s11 + $0x128] sm:$0xff] }
  0x2c   : > { %v689_v10 = vsub.f32 1.0, %v4016_v6  ;;  %v4023_v11 = vsel %vm374_vm2, 1.0, %v5282_v19  ;;  %vm376_vm4 = vcmp.eq.s32.totalorder %v313_v7, 4294967295  ;;  %v4026_v12 = vsel %vm373_vm3, 1.0, %v5282_v19  ;;  %v333_v59 = vld [vmem:[%s3922_s11 + $0x148] sm:$0xff]  ;;  %v336_v60 = vld [vmem:[%s3922_s11 + $0x160] sm:$0xff] }
  0x2d   : > { %vm375_vm5 = vcmp.eq.s32.totalorder %v312_v8, 4294967295  ;;  %v692_v17 = vsub.f32 1.0, %v4023_v11  ;;  %v4034_v18 = vsel %vm376_vm4, 1.0, %v5282_v19  ;;  %v691_v29 = vsub.f32 1.0, %v4026_v12  ;;  %v345_v24 = vld [vmem:[%s3922_s11 + $0x1a8] sm:$0xff]  ;;  %s3536_s10 = smul.u32 252, %s256_s14 }
  0x2e   : > { %773 = vperm.xlu1 %3582, %v680_v43   ;;  %768 = vperm.xlu0 %3581, %v679_v44   ;;  %v4041_v30 = vsel %vm375_vm5, 1.0, %v5282_v19  ;;  %vm378_vm6 = vcmp.eq.s32.totalorder %v315_v13, 4294967295  ;;  %vm377_vm7 = vcmp.eq.s32.totalorder %v314_v14, 4294967295  ;;  %vm387_vm8 = vcmp.eq.s32.totalorder %v324_v15, 4294967295  ;;  %v340_v13 = vld [vmem:[%s3922_s11 + $0x180] sm:$0xff]  ;;  %s5215_s12 = scalar_lea.sflag [#allocation3], %s256_s14 }
  0x2f   : > { %vm379_vm9 = vcmp.eq.s32.totalorder %v316_v16, 4294967295  ;;  %v694_v36 = vsub.f32 1.0, %v4034_v18  ;;  %vm389_vm10 = vcmp.eq.s32.totalorder %v326_v23, 4294967295  ;;  %vm388_vm11 = vcmp.eq.s32.totalorder %v325_v25, 4294967295  ;;  %v1185_v15 = vld [vmem:[%s5278_s2 + $0x40] sm:$0xff]  ;;  %v1186_v16 = vld [vmem:[%s5278_s2 + $0x48] sm:$0xff] }
  0x30   : > { %vm391_vm12 = vcmp.eq.s32.totalorder %v328_v27, 4294967295  ;;  %v693_v37 = vsub.f32 1.0, %v4041_v30  ;;  %v4049_v38 = vsel %vm378_vm6, 1.0, %v5282_v19  ;;  %v4052_v41 = vsel %vm377_vm7, 1.0, %v5282_v19  ;;  %v353_v23 = vld [vmem:[%s3922_s11 + $0x1e8] sm:$0xff] }
  0x31   : > { %vm390_vm13 = vcmp.eq.s32.totalorder %v327_v31, 4294967295  ;;  %v4055_v42 = vsel %vm387_vm8, 1.0, %v5282_v19  ;;  %v4058_v43 = vsel %vm379_vm9, 1.0, %v5282_v19  ;;  %vm393_vm14 = vcmp.eq.s32.totalorder %v330_v32, 4294967295  ;;  %v339_v32 = vld [vmem:[%s3922_s11 + $0x178] sm:$0xff] }
  0x32   : > { %783 = vperm.xlu1 %3582, %v682_v49   ;;  %778 = vperm.xlu0 %3581, %v681_v50   ;;  %vm392_vm15 = vcmp.eq.s32.totalorder %v329_v35, 4294967295  ;;  %v4061_v44 = vsel %vm389_vm10, 1.0, %v5282_v19  ;;  %v4064_v47 = vsel %vm388_vm11, 1.0, %v5282_v19  ;;  %v4067_v48 = vsel %vm391_vm12, 1.0, %v5282_v19  ;;  %v332_v49 = vld [vmem:[%s3922_s11 + $0x140] sm:$0xff]  ;;  %v331_v50 = vld [vmem:[%s3922_s11 + $0x138] sm:$0xff] }
  0x33   : > { %v696_v53 = vsub.f32 1.0, %v4049_v38  ;;  %v695_v54 = vsub.f32 1.0, %v4052_v41  ;;  %v4082_v1 = vsel %vm393_vm14, 1.0, %v5282_v19  ;;  %v4085_v2 = vsel %vm392_vm15, 1.0, %v5282_v19  ;;  %v317_v35 = vld [vmem:[%s3922_s11 + $0xc8] sm:$0xff] }
  0x34   : > { %5299 = vst [vmem:[#allocation5_spill] sm:$0xff] %v4082_v1  ;;  %v707_v7 = vsub.f32 1.0, %v4061_v44  ;;  %v706_v8 = vsub.f32 1.0, %v4064_v47  ;;  %vm395_vm0 = vcmp.eq.s32.totalorder %v332_v49, 4294967295  ;;  %vm394_vm1 = vcmp.eq.s32.totalorder %v331_v50, 4294967295  ;;  %v342_v50 = vld [vmem:[%s3922_s11 + $0x190] sm:$0xff] }
  0x35   : > { %vm396_vm3 = vcmp.eq.s32.totalorder %v333_v59, 4294967295  ;;  %vm399_vm4 = vcmp.eq.s32.totalorder %v336_v60, 4294967295  ;;  %v4104_v25 = vsel %vm395_vm0, 1.0, %v5282_v19  ;;  %vm403_vm8 = vcmp.eq.s32.totalorder %v340_v13, 4294967295 }
  0x36   : > { %793 = vperm.xlu1 %3582, %v684_v55   ;;  %788 = vperm.xlu0 %3581, %v683_v56   ;;  %v4074_v55 = vsel %vm390_vm13, 1.0, %v5282_v19  ;;  %v334_v56 = vld [vmem:[%s3922_s11 + $0x150] sm:$0xff]  ;;  %v4107_v27 = vsel %vm394_vm1, 1.0, %v5282_v19  ;;  %v4113_v31 = vsel %vm396_vm3, 1.0, %v5282_v19  ;;  %vm3805_vm9 = vmmov 0  }
  0x37   : > { %vm397_vm2 = vcmp.eq.s32.totalorder %v334_v56, 4294967295  ;;  %3322 = vmatprep.mubr.msk.f32.mxu0 %vm3805_vm9, %v5282_v19  ;;  %vm402_vm10 = vcmp.eq.s32.totalorder %v339_v32, 4294967295  ;;  %vm380_vm11 = vcmp.eq.s32.totalorder %v317_v35, 4294967295  ;;  %3418 = vmatprep.mubr.msk.f32.mxu1 %vm3805_vm9, %v5282_v19  ;;  %vm405_vm12 = vcmp.eq.s32.totalorder %v342_v50, 4294967295 }
  0x38   : > { %vm408_vm1 = vcmp.eq.s32.totalorder %v345_v24, 4294967295  ;;  %v4171_v13 = vsel %vm402_vm10, 1.0, %v5282_v19  ;;  %v4184_v32 = vsel %vm405_vm12, 1.0, %v5282_v19 }
  0x39   : > { %5300 = vst [vmem:[#allocation6_spill] sm:$0xff] %v4184_v32  ;;  %v4206_v50 = vsel %vm408_vm1, 1.0, %v5282_v19 }
  0x3a   : > { %803 = vperm.xlu1 %3582, %v686_v61   ;;  %798 = vperm.xlu0 %3581, %v685_v62   ;;  %v705_v61 = vsub.f32 1.0, %v4055_v42  ;;  %v697_v62 = vsub.f32 1.0, %v4058_v43 }
  0x3e   : > { %813 = vperm.xlu1 %3582, %v688_v3   ;;  %808 = vperm.xlu0 %3581, %v687_v4   ;;  %v335_v3 = vld [vmem:[%s3922_s11 + $0x158] sm:$0xff]  ;;  %v338_v4 = vld [vmem:[%s3922_s11 + $0x170] sm:$0xff] }
  0x3f   : > { %vm398_vm5 = vcmp.eq.s32.totalorder %v335_v3, 4294967295  ;;  %vm401_vm6 = vcmp.eq.s32.totalorder %v338_v4, 4294967295  ;;  %v4138_v3 = vsel %vm403_vm8, 1.0, %v5282_v19  ;;  %v347_v4 = vld [vmem:[%s3922_s11 + $0x1b8] sm:$0xff]  ;;  %vm416_vm8 = vcmp.eq.s32.totalorder %v353_v23, 4294967295 }
  0x40   : > { %v4121_v49 = vsel %vm398_vm5, 1.0, %v5282_v19  ;;  %v4130_v59 = vsel %vm401_vm6, 1.0, %v5282_v19 }
  0x42   : > { %823 = vperm.xlu1 %3582, %v690_v9   ;;  %818 = vperm.xlu0 %3581, %v689_v10   ;;  %v709_v9 = vsub.f32 1.0, %v4067_v48  ;;  %v337_v10 = vld [vmem:[%s3922_s11 + $0x168] sm:$0xff] }
  0x43   : > { %vm400_vm7 = vcmp.eq.s32.totalorder %v337_v10, 4294967295  ;;  %v351_v10 = vld [vmem:[%s3922_s11 + $0x1d8] sm:$0xff] }
  0x44   : > { %v4134_v60 = vsel %vm400_vm7, 1.0, %v5282_v19  ;;  %vm414_vm6 = vcmp.eq.s32.totalorder %v351_v10, 4294967295  ;;  %v713_v10 = vsub.f32 1.0, %v4104_v25 }
  0x46   : > { %833 = vperm.xlu1 %3582, %v692_v17   ;;  %828 = vperm.xlu0 %3581, %v691_v29   ;;  %v4110_v29 = vsel %vm397_vm2, 1.0, %v5282_v19  ;;  %vm410_vm2 = vcmp.eq.s32.totalorder %v347_v4, 4294967295  ;;  %v5304_v4 = vsub.f32 1.0, %v4074_v55  ;;  %v5311_v17 = vsub.f32 1.0, %v4082_v1 }
  0x47   : > { %v715_v24 = vsub.f32 1.0, %v4110_v29  ;;  %v718_v1 = vsub.f32 1.0, %v4134_v60 }
  0x4a   : > { %843 = vperm.xlu1 %3582, %v694_v36   ;;  %838 = vperm.xlu0 %3581, %v693_v37   ;;  %v3524_v36 = vpack.c.bf16 %v1186_v16, %v1185_v15  ;;  %v4118_v37 = vsel %vm399_vm4, 1.0, %v5282_v19  ;;  %v343_v15 = vld [vmem:[%s3922_s11 + $0x198] sm:$0xff]  ;;  %v346_v16 = vld [vmem:[%s3922_s11 + $0x1b0] sm:$0xff] }
  0x4b   : > { %vm406_vm15 = vcmp.eq.s32.totalorder %v343_v15, 4294967295  ;;  %vm409_vm0 = vcmp.eq.s32.totalorder %v346_v16, 4294967295  ;;  %v4214_v15 = vsel %vm410_vm2, 1.0, %v5282_v19  ;;  %v712_v16 = vsub.f32 1.0, %v4107_v27 }
  0x4c   : > { %3525 = vmatpush3.bf16.msra.mxu0 %v3524_v36  ;;  %3535 = vmatpush3.bf16.msra.mxu1 %v3524_v36  ;;  %v349_v36 = vld [vmem:[%s3922_s11 + $0x1c8] sm:$0xff]  ;;  %v4196_v28 = vsel %vm406_vm15, 1.0, %v5282_v19  ;;  %5303 = vst [vmem:[#allocation9_spill] sm:$0xff] %v4214_v15  ;;  %vm1644_vm2 = vcmask 654336  }
  0x4d   : > { %5301 = vst [vmem:[#allocation7_spill] sm:$0xff] %v4196_v28  ;;  %vm412_vm4 = vcmp.eq.s32.totalorder %v349_v36, 4294967295 }
  0x4e   : > { %853 = vperm.xlu1 %3582, %v696_v53   ;;  %848 = vperm.xlu0 %3581, %v695_v54   ;;  %v341_v53 = vld [vmem:[%s3922_s11 + $0x188] sm:$0xff]  ;;  %v344_v54 = vld [vmem:[%s3922_s11 + $0x1a0] sm:$0xff]  ;;  %v4237_v14 = vsel %vm412_vm4, 1.0, %v5282_v19 }
  0x4f   : > { %vm404_vm13 = vcmp.eq.s32.totalorder %v341_v53, 4294967295  ;;  %vm407_vm14 = vcmp.eq.s32.totalorder %v344_v54, 4294967295  ;;  %v352_v53 = vld [vmem:[%s3922_s11 + $0x1e0] sm:$0xff]  ;;  %5306 = vst [vmem:[#allocation11_spill] sm:$0xff] %v4237_v14  ;;  %v719_v54 = vsub.f32 1.0, %v4130_v59 }
  0x50   : > { %v4188_v56 = vsel %vm404_vm13, 1.0, %v5282_v19  ;;  %v4192_v35 = vsel %vm407_vm14, 1.0, %v5282_v19  ;;  %vm415_vm7 = vcmp.eq.s32.totalorder %v352_v53, 4294967295  ;;  %v714_v53 = vsub.f32 1.0, %v4113_v31 }
  0x51   : > { %v4254_v36 = vsel %vm415_vm7, 1.0, %v5282_v19 }
  0x52   : > { %898 = vperm.xlu1 %3582, %v705_v61   ;;  %858 = vperm.xlu0 %3581, %v697_v62   ;;  %v4162_v61 = vsel %vm380_vm11, 1.0, %v5282_v19  ;;  %v348_v62 = vld [vmem:[%s3922_s11 + $0x1c0] sm:$0xff]  ;;  %5309 = vst [vmem:[#allocation14_spill] sm:$0xff] %v4254_v36 }
  0x53   : > { %vm411_vm3 = vcmp.eq.s32.totalorder %v348_v62, 4294967295  ;;  %v5312_v62 = vsub.f32 1.0, %v4085_v2 }
  0x56   : > { %908 = vperm.xlu1 %3582, %v707_v7   ;;  %903 = vperm.xlu0 %3581, %v706_v8   ;;  %v350_v7 = vld [vmem:[%s3922_s11 + $0x1d0] sm:$0xff]  ;;  %v4202_v8 = vsel %vm409_vm0, 1.0, %v5282_v19 }
  0x57   : > { %5302 = vst [vmem:[#allocation8_spill] sm:$0xff] %v4202_v8  ;;  %vm413_vm5 = vcmp.eq.s32.totalorder %v350_v7, 4294967295  ;;  %v4234_v7 = vsel %vm411_vm3, 1.0, %v5282_v19 }
  0x58   : > { %5305 = vst [vmem:[#allocation10_spill] sm:$0xff] %v4234_v7  ;;  %v4244_v23 = vsel %vm413_vm5, 1.0, %v5282_v19 }
  0x59   : > { %5307 = vst [vmem:[#allocation12_spill] sm:$0xff] %v4244_v23 }
  0x5a   : > { %918 = vperm.xlu1 %3582, %v709_v9   ;;  %913 = vperm.xlu0 %3581, %v5304_v4   ;;  %v4247_v4 = vsel %vm414_vm6, 1.0, %v5282_v19  ;;  %v4257_v9 = vsel %vm416_vm8, 1.0, %v5282_v19  ;;  %v726_v19 = vsub.f32 1.0, %v4206_v50 }
  0x5b   : > { %5308 = vst [vmem:[#allocation13_spill] sm:$0xff] %v4247_v4  ;;  %5310 = vst [vmem:[#allocation15_spill] sm:$0xff] %v4257_v9 }
  0x5e   : > { %928 = vperm.xlu1 %3582, %v5311_v17   ;;  %923 = vperm.xlu0 %3581, %v5312_v62   ;;  %v717_v17 = vsub.f32 1.0, %v4118_v37  ;;  %v716_v62 = vsub.f32 1.0, %v4121_v49 }
  0x62   : > { %938 = vperm.xlu1 %3582, %v713_v10   ;;  %933 = vperm.xlu0 %3581, %v712_v16   ;;  %v721_v16 = vsub.f32 1.0, %v4138_v3  ;;  %v720_v10 = vsub.f32 1.0, %v4171_v13 }
  0x66   : > { %948 = vperm.xlu1 %3582, %v715_v24   ;;  %943 = vperm.xlu0 %3581, %v714_v53   ;;  %v723_v24 = vsub.f32 1.0, %v4184_v32  ;;  %v722_v53 = vsub.f32 1.0, %v4188_v56 }
  0x6a   : > { %958 = vperm.xlu1 %3582, %v717_v17   ;;  %953 = vperm.xlu0 %3581, %v716_v62   ;;  %v725_v17 = vsub.f32 1.0, %v4192_v35  ;;  %v724_v62 = vsub.f32 1.0, %v4196_v28 }
  0x6e   : > { %968 = vperm.xlu1 %3582, %v719_v54   ;;  %963 = vperm.xlu0 %3581, %v718_v1   ;;  %v318_v54 = vld [vmem:[%s3922_s11 + $0xd0] sm:$0xff]  ;;  %v727_v1 = vsub.f32 1.0, %v4202_v8  ;;  %v729_v8 = vsub.f32 1.0, %v4234_v7  ;;  %v731_v7 = vsub.f32 1.0, %v4244_v23  ;;  %v733_v23 = vsub.f32 1.0, %v4254_v36 }
  0x6f   : > { %vm381_vm10 = vcmp.eq.s32.totalorder %v318_v54, 4294967295 }
  0x72   : > { %978 = vperm.xlu1 %3582, %v721_v16   ;;  %973 = vperm.xlu0 %3581, %v720_v10   ;;  %v319_v16 = vld [vmem:[%s3922_s11 + $0xd8] sm:$0xff]  ;;  %v698_v10 = vsub.f32 1.0, %v4162_v61 }
  0x73   : > { %vm382_vm11 = vcmp.eq.s32.totalorder %v319_v16, 4294967295 }
  0x76   : > { %988 = vperm.xlu1 %3582, %v723_v24   ;;  %983 = vperm.xlu0 %3581, %v722_v53   ;;  %v728_v24 = vsub.f32 1.0, %v4214_v15  ;;  %v5313_v53 = vmov 0.0   ;;  %v730_v15 = vsub.f32 1.0, %v4237_v14  ;;  %v732_v14 = vsub.f32 1.0, %v4247_v4 }
  0x77   : > { %v4292_v32 = vsel %vm381_vm10, 1.0, %v5313_v53  ;;  %v4298_v54 = vsel %vm382_vm11, 1.0, %v5313_v53 }
  0x7a   : > { %998 = vperm.xlu1 %3582, %v725_v17   ;;  %993 = vperm.xlu0 %3581, %v724_v62   ;;  %v320_v17 = vld [vmem:[%s3922_s11 + $0xe0] sm:$0xff]  ;;  %v699_v62 = vsub.f32 1.0, %v4292_v32 }
  0x7b   : > { %vm383_vm12 = vcmp.eq.s32.totalorder %v320_v17, 4294967295 }
  0x7c   : > { %v4304_v16 = vsel %vm383_vm12, 1.0, %v5313_v53 }
  0x7e   : > { %1008 = vperm.xlu1 %3582, %v727_v1   ;;  %1003 = vperm.xlu0 %3581, %v726_v19   ;;  %v321_v19 = vld [vmem:[%s3922_s11 + $0xe8] sm:$0xff]  ;;  %v700_v1 = vsub.f32 1.0, %v4298_v54 }
  0x7f   : > { %vm384_vm13 = vcmp.eq.s32.totalorder %v321_v19, 4294967295 }
  0x80   : > { %v4310_v17 = vsel %vm384_vm13, 1.0, %v5313_v53 }
  0x82   : > { %863 = vperm.xlu1 %3582, %v698_v10   ;;  %1013 = vperm.xlu0 %3581, %v728_v24   ;;  %v322_v10 = vld [vmem:[%s3922_s11 + $0xf0] sm:$0xff]  ;;  %v701_v24 = vsub.f32 1.0, %v4304_v16 }
  0x83   : > { %vm385_vm14 = vcmp.eq.s32.totalorder %v322_v10, 4294967295 }
  0x84   : > { %v4316_v19 = vsel %vm385_vm14, 1.0, %v5313_v53 }
  0x86   : > { %868 = vperm.xlu1 %3582, %v699_v62   ;;  %1018 = vperm.xlu0 %3581, %v729_v8   ;;  %v323_v8 = vld [vmem:[%s3922_s11 + $0xf8] sm:$0xff]  ;;  %v702_v62 = vsub.f32 1.0, %v4310_v17 }
  0x87   : > { %vm386_vm15 = vcmp.eq.s32.totalorder %v323_v8, 4294967295 }
  0x88   : > { %v4322_v10 = vsel %vm386_vm15, 1.0, %v5313_v53 }
  0x8a   : > { %873 = vperm.xlu1 %3582, %v700_v1   ;;  %1023 = vperm.xlu0 %3581, %v730_v15   ;;  %v354_v15 = vld [vmem:[%s3922_s11 + $0x1f0] sm:$0xff]  ;;  %v703_v1 = vsub.f32 1.0, %v4316_v19  ;;  %s5088_s11 = scalar_lea.vmem [#allocation2], %s3536_s10 }
  0x8b   : > { %vm417_vm0 = vcmp.eq.s32.totalorder %v354_v15, 4294967295  ;;  %v2891_v15 = vld [vmem:[%s4333_s26] sm:$0xff]  }
  0x8c   : > { %v4328_v8 = vsel %vm417_vm0, 1.0, %v5313_v53  ;;  %v2892_v4 = vunpack.c.l.bf16 %v2891_v15 }
  0x8d   : > { %5314 = vst [vmem:[#allocation16_spill] sm:$0xff] %v4328_v8 }
  0x8e   : > { %878 = vperm.xlu1 %3582, %v701_v24   ;;  %1028 = vperm.xlu0 %3581, %v731_v7   ;;  %v704_v7 = vsub.f32 1.0, %v4322_v10  ;;  %v734_v24 = vsub.f32 1.0, %v4257_v9 }
  0x92   : > { %883 = vperm.xlu1 %3582, %v702_v62   ;;  %1033 = vperm.xlu0 %3581, %v732_v14   ;;  %v5294_v62 = vlaneseq  ;;  %v735_v14 = vsub.f32 1.0, %v4328_v8 }
  0x96   : > { %888 = vperm.xlu1 %3582, %v703_v1   ;;  %1038 = vperm.xlu0 %3581, %v733_v23   ;;  %v4337_v23 = vand.u32 127, %v5294_v62  ;;  %v5315_v1 = vpack.i.bf16 %v3943_v26, %v3936_v22  ;;  %v5317_v62 = vpack.i.bf16 %v3933_v21, %v3930_v20  ;;  %v2893_v26 = vunpack.c.h.bf16 %v2891_v15 }
  0x97   : > { %v5319_v20 = vpack.i.bf16 %v3963_v39, %v3966_v40  ;;  %v5321_v39 = vpack.i.bf16 %v3983_v51, %v3986_v52  ;;  %v5323_v51 = vpack.i.bf16 %v4003_v63, %v4006_v0  ;;  %v5325_v63 = vpack.i.bf16 %v4023_v11, %v4026_v12 }
  0x98   : > { %vm672_vm1 = vcmp.lt.s32.totalorder %v4337_v23, 40  ;;  %v5327_v11 = vpack.i.bf16 %v4049_v38, %v4052_v41  ;;  %v3653_v12 = vpack.i.bf16 %v4310_v17, %v4304_v16  ;;  %v3658_v41 = vpack.i.bf16 %v4322_v10, %v4316_v19  ;;  %v3172_v17 = vld [vmem:[%s4333_s26 + $0x20] sm:$0xff]  }
  0x99   : > { %v2908_v10 = vunpack.c.l.bf16 %v3172_v17 }
  0x9a   : > { %893 = vperm.xlu1 %3582, %v704_v7   ;;  %1043 = vperm.xlu0 %3581, %v734_v24   ;;  %v5316_v24 = vpack.i.bf16 %v3953_v33, %v3956_v34 }
  0x9e   : > { %3584 = vperm.xlu1 %3582, %v5315_v1   ;;  %1048 = vperm.xlu0 %3581, %v735_v14   ;;  %v3169_v14 = vld [vmem:[%s4333_s26 + $0x8] sm:$0xff]  }
  0x9f   : > { %v2896_v21 = vunpack.c.l.bf16 %v3169_v14 }
  0xa1   : > { %v749_v36 = vpop.permute.xlu1 %748  ;;  %v739_v9 = vpop.permute.xlu0 %738 }
  0xa2   : > { %v1051_v7 = vsel %vm672_vm1, 1.0, %v739_v9  ;;  %3594 = vperm.xlu1 %3582, %v5316_v24   ;;  %3589 = vperm.xlu0 %3581, %v5317_v62   ;;  %v5318_v9 = vpack.i.bf16 %v3973_v45, %v3976_v46  ;;  %v1053_v34 = vsel %vm672_vm1, 1.0, %v749_v36  ;;  %v5320_v45 = vpack.i.bf16 %v3993_v57, %v3996_v58  ;;  %v3170_v36 = vld [vmem:[%s4333_s26 + $0x10] sm:$0xff]  }
  0xa3   : > { %v1114_v22 = vmul.f32 %v2892_v4, %v1051_v7  ;;  %v1116_v40 = vmul.f32 %v2896_v21, %v1053_v34  ;;  %v5322_v57 = vpack.i.bf16 %v4013_v5, %v4016_v6  ;;  %v2900_v58 = vunpack.c.l.bf16 %v3170_v36 }
  0xa4   : > { %v5324_v5 = vpack.i.bf16 %v4034_v18, %v4041_v30  ;;  %v2901_v0 = vunpack.c.h.bf16 %v3170_v36  ;;  %v5326_v18 = vpack.i.bf16 %v4162_v61, %v4058_v43  ;;  %v3648_v30 = vpack.i.bf16 %v4298_v54, %v4292_v32  ;;  %v3173_v36 = vld [vmem:[%s4333_s26 + $0x28] sm:$0xff]  }
  0xa5   : > { %v754_v1 = vpop.permute.xlu1 %753  ;;  %3323 = vmatmul.mubr.msk.f32.vlgmr.msra.gmra.mrb[0].mxu0 %vm1644_vm2, %v1114_v22  ;;  %v744_v8 = vpop.permute.xlu0 %743 }
  0xa6   : > { %v1052_v28 = vsel %vm672_vm1, 1.0, %v744_v8  ;;  %3604 = vperm.xlu1 %3582, %v5318_v9   ;;  %3599 = vperm.xlu0 %3581, %v5319_v20   ;;  %v1054_v46 = vsel %vm672_vm1, 1.0, %v754_v1 }
  0xa7   : > { %v1115_v33 = vmul.f32 %v2893_v26, %v1052_v28  ;;  %3325 = vmatprep.mubr.msk.f32.mxu0 %vm3805_vm9, %v5313_v53  ;;  %v2897_v28 = vunpack.c.h.bf16 %v3169_v14  ;;  %v3171_v14 = vld [vmem:[%s4333_s26 + $0x18] sm:$0xff]  }
  0xa8   : > { %v2904_v21 = vunpack.c.l.bf16 %v3171_v14  ;;  %v2905_v16 = vunpack.c.h.bf16 %v3171_v14 }
  0xa9   : > { %v764_v4 = vpop.permute.xlu1 %763  ;;  %3326 = vmatmul.mubr.msk.f32.gmra.mrb[2].mxu0 %vm1644_vm2, %v1115_v33  ;;  %v759_v8 = vpop.permute.xlu0 %758  ;;  %v1117_v52 = vmul.f32 %v2897_v28, %v1054_v46 }
  0xaa   : > { %3614 = vperm.xlu1 %3582, %v5320_v45   ;;  %3609 = vperm.xlu0 %3581, %v5321_v39   ;;  %v1055_v7 = vsel %vm672_vm1, 1.0, %v759_v8  ;;  %v1056_v26 = vsel %vm672_vm1, 1.0, %v764_v4  ;;  %v5328_v4 = vpack.i.bf16 %v4064_v47, %v4055_v42  ;;  %v5329_v42 = vpack.i.bf16 %v4085_v2, %v4067_v48 }
  0xab   : > { %3328 = vmatprep.mubr.msk.f32.mxu0 %vm3805_vm9, %v5313_v53  ;;  %v1118_v6 = vmul.f32 %v2900_v58, %v1055_v7  ;;  %v1119_v20 = vmul.f32 %v2901_v0, %v1056_v26  ;;  %v5330_v47 = vpack.i.bf16 %v4074_v55, %v4061_v44  ;;  %v5331_v48 = vpack.i.bf16 %v4113_v31, %v4104_v25  ;;  %v5332_v44 = vld [vmem:[#allocation5_spill] sm:$0xff] }
  0xac   : > { %v5333_v55 = vpack.i.bf16 %v4107_v27, %v5332_v44  ;;  %v5334_v31 = vpack.i.bf16 %v4134_v60, %v4118_v37  ;;  %v5335_v27 = vpack.i.bf16 %v4121_v49, %v4110_v29  ;;  %v2913_v58 = vunpack.c.h.bf16 %v3173_v36  ;;  %v5351_v44 = vld [vmem:[#allocation13_spill] sm:$0xff] }
  0xad   : > { %v774_v62 = vpop.permute.xlu1 %773  ;;  %3329 = vmatmul.mubr.msk.f32.gmra.mrb[4].mxu0 %vm1644_vm2, %v1116_v40  ;;  %v769_v15 = vpop.permute.xlu0 %768  ;;  %v2909_v40 = vunpack.c.h.bf16 %v3172_v17  ;;  %v5336_v29 = vpack.i.bf16 %v4188_v56, %v4138_v3  ;;  %v5337_v49 = vpack.i.bf16 %v4171_v13, %v4130_v59  ;;  %v5338_v3 = vpack.i.bf16 %v4206_v50, %v4192_v35  ;;  %v5339_v13 = vld [vmem:[#allocation7_spill] sm:$0xff]  ;;  %v5346_v17 = vld [vmem:[#allocation8_spill] sm:$0xff] }
  0xae   : > { %3624 = vperm.xlu1 %3582, %v5322_v57   ;;  %3619 = vperm.xlu0 %3581, %v5323_v51   ;;  %v1057_v43 = vsel %vm672_vm1, 1.0, %v769_v15  ;;  %v1058_v54 = vsel %vm672_vm1, 1.0, %v774_v62  ;;  %v2912_v57 = vunpack.c.l.bf16 %v3173_v36  ;;  %v5349_v36 = vld [vmem:[#allocation14_spill] sm:$0xff] }
  0xaf   : > { %3331 = vmatprep.mubr.msk.f32.mxu0 %vm3805_vm9, %v5313_v53  ;;  %v1120_v32 = vmul.f32 %v2904_v21, %v1057_v43  ;;  %v1121_v19 = vmul.f32 %v2905_v16, %v1058_v54  ;;  %v3175_v21 = vld [vmem:[%s4333_s26 + $0x38] sm:$0xff]   ;;  %v3185_v43 = vld [vmem:[%s4333_s26 + $0x88] sm:$0xff]   ;;  %v5343_v16 = vld [vmem:[#allocation10_spill] sm:$0xff] }
  0xb0   : > { %v5345_v54 = vld [vmem:[#allocation9_spill] sm:$0xff] }
  0xb1   : > { %v784_v24 = vpop.permute.xlu1 %783  ;;  %3332 = vmatmul.mubr.msk.f32.gmra.mrb[6].mxu0 %vm1644_vm2, %v1117_v52  ;;  %v779_v22 = vpop.permute.xlu0 %778 }
  0xb2   : > { %3634 = vperm.xlu1 %3582, %v5324_v5   ;;  %3629 = vperm.xlu0 %3581, %v5325_v63   ;;  %v1059_v8 = vsel %vm672_vm1, 1.0, %v779_v22  ;;  %v1060_v46 = vsel %vm672_vm1, 1.0, %v784_v24  ;;  %v3174_v22 = vld [vmem:[%s4333_s26 + $0x30] sm:$0xff]   ;;  %v3184_v5 = vld [vmem:[%s4333_s26 + $0x80] sm:$0xff]  }
  0xb3   : > { %3334 = vmatprep.mubr.msk.f32.mxu0 %vm3805_vm9, %v5313_v53  ;;  %v1122_v28 = vmul.f32 %v2908_v10, %v1059_v8  ;;  %v1123_v2 = vmul.f32 %v2909_v40, %v1060_v46  ;;  %v2916_v0 = vunpack.c.l.bf16 %v3174_v22  ;;  %v2960_v10 = vunpack.c.l.bf16 %v3185_v43  ;;  %v5348_v46 = vld [vmem:[#allocation15_spill] sm:$0xff] }
  0xb5   : > { %v794_v1 = vpop.permute.xlu1 %793  ;;  %3335 = vmatmul.mubr.msk.f32.gmra.mrb[8].mxu0 %vm1644_vm2, %v1118_v6  ;;  %v789_v9 = vpop.permute.xlu0 %788  ;;  %v2956_v6 = vunpack.c.l.bf16 %v3184_v5 }
  0xb6   : > { %3644 = vperm.xlu1 %3582, %v5326_v18   ;;  %3639 = vperm.xlu0 %3581, %v5327_v11   ;;  %v1061_v51 = vsel %vm672_vm1, 1.0, %v789_v9  ;;  %v1062_v24 = vsel %vm672_vm1, 1.0, %v794_v1  ;;  %v5340_v1 = vld [vmem:[#allocation6_spill] sm:$0xff]  ;;  %v2917_v18 = vunpack.c.h.bf16 %v3174_v22 }
  0xb7   : > { %3337 = vmatprep.mubr.msk.f32.mxu0 %vm3805_vm9, %v5313_v53  ;;  %v1124_v7 = vmul.f32 %v2912_v57, %v1061_v51  ;;  %v1125_v60 = vmul.f32 %v2913_v58, %v1062_v24  ;;  %v5341_v9 = vpack.i.bf16 %v5339_v13, %v5340_v1  ;;  %v2921_v57 = vunpack.c.h.bf16 %v3175_v21  ;;  %v3176_v58 = vld [vmem:[%s4333_s26 + $0x40] sm:$0xff]  }
  0xb9   : > { %v4416_v61 = vpop.permute.xlu1 %803  ;;  %3338 = vmatmul.mubr.msk.f32.gmra.mrb[10].mxu0 %vm1644_vm2, %v1119_v20  ;;  %v799_v38 = vpop.permute.xlu0 %798 }
  0xba   : > { %3654 = vperm.xlu1 %3582, %v3653_v12   ;;  %3649 = vperm.xlu0 %3581, %v3648_v30   ;;  %v1063_v26 = vsel %vm672_vm1, 1.0, %v799_v38  ;;  %v2957_v30 = vunpack.c.h.bf16 %v3184_v5  ;;  %v1064_v20 = vsel %vm672_vm1, 1.0, %v4416_v61 }
  0xbb   : > { %3340 = vmatprep.mubr.msk.f32.mxu0 %vm3805_vm9, %v5313_v53  ;;  %v1126_v11 = vmul.f32 %v2916_v0, %v1063_v26  ;;  %v1127_v61 = vmul.f32 %v2917_v18, %v1064_v20  ;;  %v3177_v18 = vld [vmem:[%s4333_s26 + $0x48] sm:$0xff]  }
  0xbd   : > { %v4426_v33 = vpop.permute.xlu1 %813  ;;  %3341 = vmatmul.mubr.msk.f32.gmra.mrb[12].mxu0 %vm1644_vm2, %v1120_v32  ;;  %v4429_v34 = vpop.permute.xlu0 %808 }
  0xbe   : > { %3664 = vperm.xlu1 %3582, %v5328_v4   ;;  %3659 = vperm.xlu0 %3581, %v3658_v41   ;;  %v5342_v41 = vld [vmem:[#allocation11_spill] sm:$0xff]  ;;  %v5347_v4 = vpack.i.bf16 %v5345_v54, %v5346_v17 }
  0xbf   : > { %3343 = vmatprep.mubr.msk.f32.mxu0 %vm3805_vm9, %v5313_v53  ;;  %v5344_v32 = vpack.i.bf16 %v5342_v41, %v5343_v16 }
  0xc1   : > { %v4438_v45 = vpop.permute.xlu1 %823  ;;  %3344 = vmatmul.mubr.msk.f32.gmra.mrb[14].mxu0 %vm1644_vm2, %v1121_v19  ;;  %v4441_v39 = vpop.permute.xlu0 %818  ;;  %v2920_v19 = vunpack.c.l.bf16 %v3175_v21 }
  0xc2   : > { %3674 = vperm.xlu1 %3582, %v5329_v42   ;;  %3669 = vperm.xlu0 %3581, %v5330_v47   ;;  %v1065_v42 = vsel %vm672_vm1, 1.0, %v4429_v34 }
  0xc3   : > { %3346 = vmatprep.mubr.msk.f32.mxu0 %vm3805_vm9, %v5313_v53  ;;  %v1128_v34 = vmul.f32 %v2920_v19, %v1065_v42  ;;  %v3188_v19 = vld [vmem:[%s4333_s26 + $0xa0] sm:$0xff]  }
  0xc5   : > { %v4454_v62 = vpop.permute.xlu1 %833  ;;  %3347 = vmatmul.mubr.msk.f32.gmra.mrb[16].mxu0 %vm1644_vm2, %v1122_v28  ;;  %v4457_v15 = vpop.permute.xlu0 %828 }
  0xc6   : > { %3684 = vperm.xlu1 %3582, %v5331_v48   ;;  %3679 = vperm.xlu0 %3581, %v5333_v55   ;;  %v5350_v48 = vpack.i.bf16 %v5348_v46, %v5349_v36  ;;  %v5352_v55 = vld [vmem:[#allocation12_spill] sm:$0xff] }
  0xc7   : > { %3349 = vmatprep.mubr.msk.f32.mxu0 %vm3805_vm9, %v5313_v53 }
  0xc9   : > { %v4469_v52 = vpop.permute.xlu1 %843  ;;  %3350 = vmatmul.mubr.msk.f32.gmra.mrb[18].mxu0 %vm1644_vm2, %v1123_v2  ;;  %v4472_v25 = vpop.permute.xlu0 %838  ;;  %v5353_v2 = vpack.i.bf16 %v5351_v44, %v5352_v55 }
  0xca   : > { %3694 = vperm.xlu1 %3582, %v5334_v31   ;;  %3689 = vperm.xlu0 %3581, %v5335_v27   ;;  %v2961_v31 = vunpack.c.h.bf16 %v3185_v43  ;;  %v1066_v27 = vsel %vm672_vm1, 1.0, %v4426_v33  ;;  %v1071_v46 = vsel %vm672_vm1, 1.0, %v4472_v25 }
  0xcb   : > { %3352 = vmatprep.mubr.msk.f32.mxu0 %vm3805_vm9, %v5313_v53 }
  0xcd   : > { %v4486_v63 = vpop.permute.xlu1 %853  ;;  %3353 = vmatmul.mubr.msk.f32.gmra.mrb[20].mxu0 %vm1644_vm2, %v1124_v7  ;;  %v4489_v37 = vpop.permute.xlu0 %848  ;;  %v3186_v7 = vld [vmem:[%s4333_s26 + $0x90] sm:$0xff]  }
  0xce   : > { %3704 = vperm.xlu1 %3582, %v5336_v29   ;;  %3699 = vperm.xlu0 %3581, %v5337_v49   ;;  %v5354_v29 = vld [vmem:[#allocation16_spill] sm:$0xff]  ;;  %v1129_v49 = vmul.f32 %v2921_v57, %v1066_v27  ;;  %v2964_v0 = vunpack.c.l.bf16 %v3186_v7  ;;  %v2973_v57 = vunpack.c.h.bf16 %v3188_v19 }
  0xcf   : > { %3355 = vmatprep.mubr.msk.f32.mxu0 %vm3805_vm9, %v5313_v53 }
  0xd1   : > { %v899_v14 = vpop.permute.xlu1 %898  ;;  %3356 = vmatmul.mubr.msk.f32.gmra.mrb[22].mxu0 %vm1644_vm2, %v1125_v60  ;;  %v4502_v56 = vpop.permute.xlu0 %858  ;;  %v2924_v60 = vunpack.c.l.bf16 %v3176_v58 }
  0xd2   : > { %v1083_v59 = vsel %vm672_vm1, 1.0, %v899_v14  ;;  %3714 = vperm.xlu1 %3582, %v5338_v3   ;;  %3709 = vperm.xlu0 %3581, %v5341_v9   ;;  %v2925_v3 = vunpack.c.h.bf16 %v3176_v58  ;;  %v2965_v9 = vunpack.c.h.bf16 %v3186_v7 }
  0xd3   : > { %v1146_v12 = vmul.f32 %v2956_v6, %v1083_v59  ;;  %3358 = vmatprep.mubr.msk.f32.mxu0 %vm3805_vm9, %v5313_v53  ;;  %v1067_v6 = vsel %vm672_vm1, 1.0, %v4441_v39  ;;  %v1068_v39 = vsel %vm672_vm1, 1.0, %v4438_v45  ;;  %v2928_v45 = vunpack.c.l.bf16 %v3177_v18 }
  0xd4   : > { %v1130_v13 = vmul.f32 %v2924_v60, %v1067_v6  ;;  %v1131_v21 = vmul.f32 %v2925_v3, %v1068_v39  ;;  %v3190_v3 = vld [vmem:[%s4333_s26 + $0xb0] sm:$0xff]  }
  0xd5   : > { %3419 = vmatmul.mubr.msk.f32.vlgmr.msra.gmra.mrb[0].mxu1 %vm1644_vm2, %v1146_v12  ;;  %v909_v35 = vpop.permute.xlu1 %908  ;;  %3359 = vmatmul.mubr.msk.f32.gmra.mrb[24].mxu0 %vm1644_vm2, %v1126_v11  ;;  %v904_v50 = vpop.permute.xlu0 %903  ;;  %v3187_v11 = vld [vmem:[%s4333_s26 + $0x98] sm:$0xff]  }
  0xd6   : > { %v1084_v38 = vsel %vm672_vm1, 1.0, %v904_v50  ;;  %3724 = vperm.xlu1 %3582, %v5344_v32   ;;  %3719 = vperm.xlu0 %3581, %v5347_v4   ;;  %v1085_v47 = vsel %vm672_vm1, 1.0, %v909_v35  ;;  %v2968_v43 = vunpack.c.l.bf16 %v3187_v11  ;;  %v1069_v50 = vsel %vm672_vm1, 1.0, %v4457_v15 }
  0xd7   : > { %v1147_v8 = vmul.f32 %v2957_v30, %v1084_v38  ;;  %3361 = vmatprep.mubr.msk.f32.mxu0 %vm3805_vm9, %v5313_v53  ;;  %3421 = vmatprep.mubr.msk.f32.mxu1 %vm3805_vm9, %v5313_v53  ;;  %v1148_v51 = vmul.f32 %v2960_v10, %v1085_v47  ;;  %v2929_v32 = vunpack.c.h.bf16 %v3177_v18  ;;  %v1132_v54 = vmul.f32 %v2928_v45, %v1069_v50  ;;  %v3191_v50 = vld [vmem:[%s4333_s26 + $0xb8] sm:$0xff]  }
  0xd8   : > { %v2969_v15 = vunpack.c.h.bf16 %v3187_v11  ;;  %v1070_v4 = vsel %vm672_vm1, 1.0, %v4454_v62  ;;  %v2980_v18 = vunpack.c.l.bf16 %v3190_v3 }
  0xd9   : > { %v919_v40 = vpop.permute.xlu1 %918  ;;  %3362 = vmatmul.mubr.msk.f32.gmra.mrb[26].mxu0 %vm1644_vm2, %v1127_v61  ;;  %3422 = vmatmul.mubr.msk.f32.gmra.mrb[2].mxu1 %vm1644_vm2, %v1147_v8  ;;  %v914_v28 = vpop.permute.xlu0 %913  ;;  %v3178_v61 = vld [vmem:[%s4333_s26 + $0x50] sm:$0xff]   ;;  %v1133_v62 = vmul.f32 %v2929_v32, %v1070_v4 }
  0xda   : > { %3734 = vperm.xlu1 %3582, %v5350_v48   ;;  %3729 = vperm.xlu0 %3581, %v5353_v2   ;;  %v1086_v24 = vsel %vm672_vm1, 1.0, %v914_v28  ;;  %v1087_v26 = vsel %vm672_vm1, 1.0, %v919_v40  ;;  %v2932_v47 = vunpack.c.l.bf16 %v3178_v61  ;;  %v2972_v40 = vunpack.c.l.bf16 %v3188_v19 }
  0xdb   : > { %3364 = vmatprep.mubr.msk.f32.mxu0 %vm3805_vm9, %v5313_v53  ;;  %3424 = vmatprep.mubr.msk.f32.mxu1 %vm3805_vm9, %v5313_v53  ;;  %v1149_v33 = vmul.f32 %v2961_v31, %v1086_v24  ;;  %v1150_v1 = vmul.f32 %v2964_v0, %v1087_v26  ;;  %v2933_v55 = vunpack.c.h.bf16 %v3178_v61  ;;  %v3189_v31 = vld [vmem:[%s4333_s26 + $0xa8] sm:$0xff]  }
  0xdc   : > { %v1134_v2 = vmul.f32 %v2932_v47, %v1071_v46  ;;  %v2977_v26 = vunpack.c.h.bf16 %v3189_v31  ;;  %v3192_v46 = vld [vmem:[%s4333_s26 + $0xc0] sm:$0xff]  }
  0xdd   : > { %v929_v22 = vpop.permute.xlu1 %928  ;;  %3365 = vmatmul.mubr.msk.f32.gmra.mrb[28].mxu0 %vm1644_vm2, %v1128_v34  ;;  %3425 = vmatmul.mubr.msk.f32.gmra.mrb[4].mxu1 %vm1644_vm2, %v1148_v51  ;;  %v924_v5 = vpop.permute.xlu0 %923  ;;  %v1072_v34 = vsel %vm672_vm1, 1.0, %v4469_v52  ;;  %v3179_v51 = vld [vmem:[%s4333_s26 + $0x58] sm:$0xff]  }
  0xde   : > { %1503 = vperm.xlu0 %3581, %v5354_v29   ;;  %3367 = vmatprep.mubr.msk.f32.mxu0 %vm3805_vm9, %v5313_v53  ;;  %v1088_v12 = vsel %vm672_vm1, 1.0, %v924_v5  ;;  %v1089_v38 = vsel %vm672_vm1, 1.0, %v929_v22  ;;  %v1135_v52 = vmul.f32 %v2933_v55, %v1072_v34  ;;  %v2936_v24 = vunpack.c.l.bf16 %v3179_v51 }
  0xdf   : > { %3427 = vmatprep.mubr.msk.f32.mxu1 %vm3805_vm9, %v5313_v53  ;;  %v1151_v35 = vmul.f32 %v2965_v9, %v1088_v12  ;;  %v1152_v17 = vmul.f32 %v2968_v43, %v1089_v38  ;;  %v2976_v22 = vunpack.c.l.bf16 %v3189_v31  ;;  %v1073_v29 = vsel %vm672_vm1, 1.0, %v4489_v37 }
  0xe0   : > { %v1136_v37 = vmul.f32 %v2936_v24, %v1073_v29  ;;  %v1075_v12 = vsel %vm672_vm1, 1.0, %v4502_v56  ;;  %v2981_v43 = vunpack.c.h.bf16 %v3190_v3  ;;  %v2988_v34 = vunpack.c.l.bf16 %v3192_v46 }
  0xe1   : > { %v939_v14 = vpop.permute.xlu1 %938  ;;  %3368 = vmatmul.mubr.msk.f32.gmra.mrb[30].mxu0 %vm1644_vm2, %v1129_v49  ;;  %3428 = vmatmul.mubr.msk.f32.gmra.mrb[6].mxu1 %vm1644_vm2, %v1149_v33  ;;  %v934_v59 = vpop.permute.xlu0 %933  ;;  %v2937_v33 = vunpack.c.h.bf16 %v3179_v51  ;;  %v2989_v29 = vunpack.c.h.bf16 %v3192_v46  ;;  %v1187_v46 = vld [vmem:[%s5279_s3] sm:$0x1] }
  0xe2   : > { %3370 = vmatprep.mubr.msk.f32.mxu0 %vm3805_vm9, %v5313_v53  ;;  %3430 = vmatprep.mubr.msk.f32.mxu1 %vm3805_vm9, %v5313_v53  ;;  %v1090_v10 = vsel %vm672_vm1, 1.0, %v934_v59  ;;  %v1091_v36 = vsel %vm672_vm1, 1.0, %v939_v14  ;;  %v1074_v14 = vsel %vm672_vm1, 1.0, %v4486_v63  ;;  %v3180_v59 = vld [vmem:[%s4333_s26 + $0x60] sm:$0xff]  }
  0xe3   : > { %v1153_v28 = vmul.f32 %v2969_v15, %v1090_v10  ;;  %v1154_v25 = vmul.f32 %v2972_v40, %v1091_v36  ;;  %v1137_v63 = vmul.f32 %v2937_v33, %v1074_v14  ;;  %v2940_v39 = vunpack.c.l.bf16 %v3180_v59  ;;  %v3193_v33 = vld [vmem:[%s4333_s26 + $0xc8] sm:$0xff]  }
  0xe4   : > { %v2985_v40 = vunpack.c.h.bf16 %v3191_v50  ;;  %v2992_v3 = vunpack.c.l.bf16 %v3193_v33 }
  0xe5   : > { %v4582_v30 = vpop.permute.xlu1 %948  ;;  %3371 = vmatmul.mubr.msk.f32.gmra.mrb[32].mxu0 %vm1644_vm2, %v1130_v13  ;;  %3431 = vmatmul.mubr.msk.f32.gmra.mrb[8].mxu1 %vm1644_vm2, %v1150_v1  ;;  %v944_v20 = vpop.permute.xlu0 %943  ;;  %v1138_v56 = vmul.f32 %v2940_v39, %v1075_v12 }
  0xe6   : > { %3373 = vmatprep.mubr.msk.f32.mxu0 %vm3805_vm9, %v5313_v53  ;;  %3433 = vmatprep.mubr.msk.f32.mxu1 %vm3805_vm9, %v5313_v53  ;;  %v1092_v27 = vsel %vm672_vm1, 1.0, %v944_v20  ;;  %v1093_v49 = vsel %vm672_vm1, 1.0, %v4582_v30 }
  0xe7   : > { %v1155_v5 = vmul.f32 %v2973_v57, %v1092_v27  ;;  %v1156_v6 = vmul.f32 %v2976_v22, %v1093_v49 }
  0xe9   : > { %v4595_v41 = vpop.permute.xlu1 %958  ;;  %3374 = vmatmul.mubr.msk.f32.gmra.mrb[34].mxu0 %vm1644_vm2, %v1131_v21  ;;  %3434 = vmatmul.mubr.msk.f32.gmra.mrb[10].mxu1 %vm1644_vm2, %v1151_v35  ;;  %v954_v16 = vpop.permute.xlu0 %953  ;;  %v2941_v35 = vunpack.c.h.bf16 %v3180_v59 }
  0xea   : > { %3376 = vmatprep.mubr.msk.f32.mxu0 %vm3805_vm9, %v5313_v53  ;;  %3436 = vmatprep.mubr.msk.f32.mxu1 %vm3805_vm9, %v5313_v53  ;;  %v1094_v13 = vsel %vm672_vm1, 1.0, %v954_v16  ;;  %v1095_v30 = vsel %vm672_vm1, 1.0, %v4595_v41  ;;  %v3181_v16 = vld [vmem:[%s4333_s26 + $0x68] sm:$0xff]  }
  0xeb   : > { %v1157_v11 = vmul.f32 %v2977_v26, %v1094_v13  ;;  %v1158_v45 = vmul.f32 %v2980_v18, %v1095_v30  ;;  %v2944_v61 = vunpack.c.l.bf16 %v3181_v16  ;;  %v3183_v26 = vld [vmem:[%s4333_s26 + $0x78] sm:$0xff]  }
  0xed   : > { %v4610_v8 = vpop.permute.xlu1 %968  ;;  %3377 = vmatmul.mubr.msk.f32.gmra.mrb[36].mxu0 %vm1644_vm2, %v1132_v54  ;;  %3437 = vmatmul.mubr.msk.f32.gmra.mrb[12].mxu1 %vm1644_vm2, %v1152_v17  ;;  %v4614_v42 = vpop.permute.xlu0 %963  ;;  %v2984_v17 = vunpack.c.l.bf16 %v3191_v50 }
  0xee   : > { %3379 = vmatprep.mubr.msk.f32.mxu0 %vm3805_vm9, %v5313_v53  ;;  %3439 = vmatprep.mubr.msk.f32.mxu1 %vm3805_vm9, %v5313_v53  ;;  %v1096_v38 = vsel %vm672_vm1, 1.0, %v4614_v42  ;;  %v1097_v19 = vsel %vm672_vm1, 1.0, %v4610_v8  ;;  %v2945_v8 = vunpack.c.h.bf16 %v3181_v16 }
  0xef   : > { %v1159_v15 = vmul.f32 %v2981_v43, %v1096_v38  ;;  %v1160_v47 = vmul.f32 %v2984_v17, %v1097_v19  ;;  %v3195_v19 = vld [vmem:[%s4333_s26 + $0xd8] sm:$0xff]  }
  0xf1   : > { %v4625_v48 = vpop.permute.xlu1 %978  ;;  %3380 = vmatmul.mubr.msk.f32.gmra.mrb[38].mxu0 %vm1644_vm2, %v1133_v62  ;;  %3440 = vmatmul.mubr.msk.f32.gmra.mrb[14].mxu1 %vm1644_vm2, %v1153_v28  ;;  %v4629_v44 = vpop.permute.xlu0 %973 }
  0xf2   : > { %3382 = vmatprep.mubr.msk.f32.mxu0 %vm3805_vm9, %v5313_v53  ;;  %3442 = vmatprep.mubr.msk.f32.mxu1 %vm3805_vm9, %v5313_v53  ;;  %v1098_v36 = vsel %vm672_vm1, 1.0, %v4629_v44  ;;  %v1099_v27 = vsel %vm672_vm1, 1.0, %v4625_v48 }
  0xf3   : > { %v1161_v44 = vmul.f32 %v2985_v40, %v1098_v36 }
  0xf5   : > { %v4642_v58 = vpop.permute.xlu1 %988  ;;  %3383 = vmatmul.mubr.msk.f32.gmra.mrb[40].mxu0 %vm1644_vm2, %v1134_v2  ;;  %3443 = vmatmul.mubr.msk.f32.gmra.mrb[16].mxu1 %vm1644_vm2, %v1154_v25  ;;  %v4646_v7 = vpop.permute.xlu0 %983  ;;  %v3182_v2 = vld [vmem:[%s4333_s26 + $0x70] sm:$0xff]  }
  0xf6   : > { %3385 = vmatprep.mubr.msk.f32.mxu0 %vm3805_vm9, %v5313_v53  ;;  %3445 = vmatprep.mubr.msk.f32.mxu1 %vm3805_vm9, %v5313_v53  ;;  %v2948_v31 = vunpack.c.l.bf16 %v3182_v2  ;;  %v2949_v48 = vunpack.c.h.bf16 %v3182_v2  ;;  %v1101_v39 = vsel %vm672_vm1, 1.0, %v4642_v58  ;;  %v2953_v58 = vunpack.c.h.bf16 %v3183_v26 }
  0xf7   : > { %v1164_v30 = vmul.f32 %v2992_v3, %v1101_v39 }
  0xf9   : > { %v4658_v60 = vpop.permute.xlu1 %998  ;;  %3386 = vmatmul.mubr.msk.f32.gmra.mrb[42].mxu0 %vm1644_vm2, %v1135_v52  ;;  %3446 = vmatmul.mubr.msk.f32.gmra.mrb[18].mxu1 %vm1644_vm2, %v1155_v5  ;;  %v4662_v0 = vpop.permute.xlu0 %993  ;;  %v1162_v5 = vmul.f32 %v2988_v34, %v1099_v27  ;;  %v3196_v27 = vld [vmem:[%s4333_s26 + $0xe0] sm:$0xff]  }
  0xfa   : > { %3388 = vmatprep.mubr.msk.f32.mxu0 %vm3805_vm9, %v5313_v53  ;;  %3448 = vmatprep.mubr.msk.f32.mxu1 %vm3805_vm9, %v5313_v53  ;;  %v1102_v43 = vsel %vm672_vm1, 1.0, %v4662_v0 }
  0xfd   : > { %v4675_v1 = vpop.permute.xlu1 %1008  ;;  %3389 = vmatmul.mubr.msk.f32.gmra.mrb[44].mxu0 %vm1644_vm2, %v1136_v37  ;;  %3449 = vmatmul.mubr.msk.f32.gmra.mrb[20].mxu1 %vm1644_vm2, %v1156_v6  ;;  %v4679_v9 = vpop.permute.xlu0 %1003  ;;  %v1100_v37 = vsel %vm672_vm1, 1.0, %v4646_v7 }
  0xfe   : > { %3391 = vmatprep.mubr.msk.f32.mxu0 %vm3805_vm9, %v5313_v53  ;;  %3451 = vmatprep.mubr.msk.f32.mxu1 %vm3805_vm9, %v5313_v53  ;;  %v1163_v7 = vmul.f32 %v2989_v29, %v1100_v37  ;;  %v1105_v36 = vsel %vm672_vm1, 1.0, %v4675_v1 }
 0x101   : > { %v864_v20 = vpop.permute.xlu1 %863  ;;  %3392 = vmatmul.mubr.msk.f32.gmra.mrb[46].mxu0 %vm1644_vm2, %v1137_v63  ;;  %3452 = vmatmul.mubr.msk.f32.gmra.mrb[22].mxu1 %vm1644_vm2, %v1157_v11  ;;  %v4694_v21 = vpop.permute.xlu0 %1013  ;;  %v2952_v63 = vunpack.c.l.bf16 %v3183_v26  ;;  %v3005_v26 = vunpack.c.h.bf16 %v3196_v27 }
 0x102   : > { %3394 = vmatprep.mubr.msk.f32.mxu0 %vm3805_vm9, %v5313_v53  ;;  %3454 = vmatprep.mubr.msk.f32.mxu1 %vm3805_vm9, %v5313_v53  ;;  %v1076_v41 = vsel %vm672_vm1, 1.0, %v864_v20  ;;  %v2993_v20 = vunpack.c.h.bf16 %v3193_v33  ;;  %v3004_v33 = vunpack.c.l.bf16 %v3196_v27 }
 0x103   : > { %v1139_v4 = vmul.f32 %v2941_v35, %v1076_v41 }
 0x104   : > { %v1165_v0 = vmul.f32 %v2993_v20, %v1102_v43 }
 0x105   : > { %v869_v32 = vpop.permute.xlu1 %868  ;;  %3395 = vmatmul.mubr.msk.f32.gmra.mrb[48].mxu0 %vm1644_vm2, %v1138_v56  ;;  %3455 = vmatmul.mubr.msk.f32.gmra.mrb[24].mxu1 %vm1644_vm2, %v1158_v45  ;;  %v4709_v54 = vpop.permute.xlu0 %1018  ;;  %v3194_v45 = vld [vmem:[%s4333_s26 + $0xd0] sm:$0xff]  }
 0x106   : > { %3397 = vmatprep.mubr.msk.f32.mxu0 %vm3805_vm9, %v5313_v53  ;;  %3457 = vmatprep.mubr.msk.f32.mxu1 %vm3805_vm9, %v5313_v53  ;;  %v1077_v10 = vsel %vm672_vm1, 1.0, %v869_v32  ;;  %v2996_v41 = vunpack.c.l.bf16 %v3194_v45  ;;  %v1103_v32 = vsel %vm672_vm1, 1.0, %v4658_v60 }
 0x107   : > { %v1140_v28 = vmul.f32 %v2944_v61, %v1077_v10  ;;  %v2997_v61 = vunpack.c.h.bf16 %v3194_v45  ;;  %v1104_v10 = vsel %vm672_vm1, 1.0, %v4679_v9  ;;  %v1189_v9 = vld [vmem:[%s5280_s4] sm:$0x1] }
 0x108   : > { %v1190_v34 = vsub.f32 %v1189_v9, %v1187_v46 }
 0x109   : > { %v874_v42 = vpop.permute.xlu1 %873  ;;  %3398 = vmatmul.mubr.msk.f32.gmra.mrb[50].mxu0 %vm1644_vm2, %v1139_v4  ;;  %3458 = vmatmul.mubr.msk.f32.gmra.mrb[26].mxu1 %vm1644_vm2, %v1159_v15  ;;  %v4722_v62 = vpop.permute.xlu0 %1023  ;;  %v1166_v4 = vmul.f32 %v2996_v41, %v1103_v32 }
 0x10a   : > { %3400 = vmatprep.mubr.msk.f32.mxu0 %vm3805_vm9, %v5313_v53  ;;  %3460 = vmatprep.mubr.msk.f32.mxu1 %vm3805_vm9, %v5313_v53  ;;  %v1078_v55 = vsel %vm672_vm1, 1.0, %v874_v42 }
 0x10b   : > { %v1141_v51 = vmul.f32 %v2945_v8, %v1078_v55  ;;  %v1167_v8 = vmul.f32 %v2997_v61, %v1104_v10 }
 0x10d   : > { %v879_v25 = vpop.permute.xlu1 %878  ;;  %3401 = vmatmul.mubr.msk.f32.gmra.mrb[52].mxu0 %vm1644_vm2, %v1140_v28  ;;  %3461 = vmatmul.mubr.msk.f32.gmra.mrb[28].mxu1 %vm1644_vm2, %v1160_v47  ;;  %v4737_v57 = vpop.permute.xlu0 %1028  ;;  %v5355_v47 = vlaneseq  ;;  %v3000_v28 = vunpack.c.l.bf16 %v3195_v19 }
 0x10e   : > { %3403 = vmatprep.mubr.msk.f32.mxu0 %vm3805_vm9, %v5313_v53  ;;  %3463 = vmatprep.mubr.msk.f32.mxu1 %vm3805_vm9, %v5313_v53  ;;  %v1079_v52 = vsel %vm672_vm1, 1.0, %v879_v25 }
 0x10f   : > { %v1142_v49 = vmul.f32 %v2948_v31, %v1079_v52  ;;  %v1508_v40 = vshrl.u32 %v5355_v47, 7  ;;  %v1106_v31 = vsel %vm672_vm1, 1.0, %v4694_v21  ;;  %v1107_v21 = vsel %vm672_vm1, 1.0, %v4709_v54 }
 0x111   : > { %v884_v24 = vpop.permute.xlu1 %883  ;;  %3404 = vmatmul.mubr.msk.f32.gmra.mrb[54].mxu0 %vm1644_vm2, %v1141_v51  ;;  %3464 = vmatmul.mubr.msk.f32.gmra.mrb[30].mxu1 %vm1644_vm2, %v1161_v44  ;;  %v4750_v22 = vpop.permute.xlu0 %1033  ;;  %v1509_v25 = vsub.s32 0, %v1508_v40  ;;  %v1168_v44 = vmul.f32 %v3000_v28, %v1105_v36  ;;  %v3001_v51 = vunpack.c.h.bf16 %v3195_v19 }
 0x112   : > { %3406 = vmatprep.mubr.msk.f32.mxu0 %vm3805_vm9, %v5313_v53  ;;  %3466 = vmatprep.mubr.msk.f32.mxu1 %vm3805_vm9, %v5313_v53  ;;  %v1080_v6 = vsel %vm672_vm1, 1.0, %v884_v24  ;;  %v1188_v24 = vmul.f32 2.0, %v1187_v46 }
 0x113   : > { %v1143_v13 = vmul.f32 %v2949_v48, %v1080_v6  ;;  %v1169_v48 = vmul.f32 %v3001_v51, %v1106_v31 }
 0x115   : > { %v889_v14 = vpop.permute.xlu1 %888  ;;  %3407 = vmatmul.mubr.msk.f32.gmra.mrb[56].mxu0 %vm1644_vm2, %v1142_v49  ;;  %3467 = vmatmul.mubr.msk.f32.gmra.mrb[32].mxu1 %vm1644_vm2, %v1162_v5  ;;  %v4765_v59 = vpop.permute.xlu0 %1038  ;;  %v4846_v5 = vrot.slane %v1190_v34, %v1509_v25 }
 0x116   : > { %3409 = vmatprep.mubr.msk.f32.mxu0 %vm3805_vm9, %v5313_v53  ;;  %3469 = vmatprep.mubr.msk.f32.mxu1 %vm3805_vm9, %v5313_v53  ;;  %v1081_v18 = vsel %vm672_vm1, 1.0, %v889_v14  ;;  %v1108_v14 = vsel %vm672_vm1, 1.0, %v4722_v62 }
 0x117   : > { %v1144_v56 = vmul.f32 %v2952_v63, %v1081_v18  ;;  %v3197_v63 = vld [vmem:[%s4333_s26 + $0xe8] sm:$0xff]  }
 0x118   : > { %v3008_v41 = vunpack.c.l.bf16 %v3197_v63  ;;  %v3009_v34 = vunpack.c.h.bf16 %v3197_v63 }
 0x119   : > { %v894_v11 = vpop.permute.xlu1 %893  ;;  %3410 = vmatmul.mubr.msk.f32.gmra.mrb[58].mxu0 %vm1644_vm2, %v1143_v13  ;;  %3470 = vmatmul.mubr.msk.f32.gmra.mrb[34].mxu1 %vm1644_vm2, %v1163_v7  ;;  %v4778_v12 = vpop.permute.xlu0 %1043  ;;  %v4859_v13 = vrot.slane %v1188_v24, %v1509_v25 }
 0x11a   : > { %3412 = vmatprep.mubr.msk.f32.mxu0 %vm3805_vm9, %v5313_v53  ;;  %3472 = vmatprep.mubr.msk.f32.mxu1 %vm3805_vm9, %v5313_v53  ;;  %v1082_v35 = vsel %vm672_vm1, 1.0, %v894_v11 }
 0x11b   : > { %v1145_v16 = vmul.f32 %v2953_v58, %v1082_v35  ;;  %v1171_v35 = vmul.f32 %v3005_v26, %v1108_v14 }
 0x11d   : > { %v4790_v50 = vpop.permute.xlu1 %3584  ;;  %3413 = vmatmul.mubr.msk.f32.gmra.mrb[60].mxu0 %vm1644_vm2, %v1144_v56  ;;  %3473 = vmatmul.mubr.msk.f32.gmra.mrb[36].mxu1 %vm1644_vm2, %v1164_v30  ;;  %v4794_v38 = vpop.permute.xlu0 %1048  ;;  %v1170_v30 = vmul.f32 %v3004_v33, %v1107_v21 }
 0x11e   : > { %3415 = vmatprep.mubr.msk.f32.mxu0 %vm3805_vm9, %v5313_v53  ;;  %3475 = vmatprep.mubr.msk.f32.mxu1 %vm3805_vm9, %v5313_v53 }
 0x121   : > { %v4803_v17 = vpop.permute.xlu1 %3594  ;;  %3416 = vmatmul.mubr.msk.f32.gmra.mrb[62].mxu0 %vm1644_vm2, %v1145_v16  ;;  %3476 = vmatmul.mubr.msk.f32.gmra.mrb[38].mxu1 %vm1644_vm2, %v1165_v0  ;;  %v4807_v15 = vpop.permute.xlu0 %3589  ;;  %v1109_v0 = vsel %vm672_vm1, 1.0, %v4737_v57 }
 0x122   : > { %3478 = vmatprep.mubr.msk.f32.mxu1 %vm3805_vm9, %v5313_v53  ;;  %v1172_v25 = vmul.f32 %v3008_v41, %v1109_v0 }
 0x125   : > { %v4815_v42 = vpop.permute.xlu1 %3604  ;;  %3479 = vmatmul.mubr.msk.f32.gmra.mrb[40].mxu1 %vm1644_vm2, %v1166_v4  ;;  %v4818_v60 = vpop.permute.xlu0 %3599 }
 0x126   : > { %3481 = vmatprep.mubr.msk.f32.mxu1 %vm3805_vm9, %v5313_v53 }
 0x129   : > { %v4832_v55 = vpop.permute.xlu1 %3614  ;;  %3482 = vmatmul.mubr.msk.f32.gmra.mrb[42].mxu1 %vm1644_vm2, %v1167_v8  ;;  %v4835_v2 = vpop.permute.xlu0 %3609 }
 0x12a   : > { %3484 = vmatprep.mubr.msk.f32.mxu1 %vm3805_vm9, %v5313_v53 }
 0x12d   : > { %v3625_v52 = vpop.permute.xlu1 %3624  ;;  %3485 = vmatmul.mubr.msk.f32.gmra.mrb[44].mxu1 %vm1644_vm2, %v1168_v44  ;;  %v4844_v1 = vpop.permute.xlu0 %3619  ;;  %v1110_v44 = vsel %vm672_vm1, 1.0, %v4750_v22 }
 0x12e   : > { %v3627_v29 = vunpack.i.h.bf16 %v3625_v52  ;;  %v3626_v49 = vunpack.i.l.bf16 %v3625_v52  ;;  %3487 = vmatprep.mubr.msk.f32.mxu1 %vm3805_vm9, %v5313_v53  ;;  %v1173_v63 = vmul.f32 %v3009_v34, %v1110_v44 }
 0x130   : > { %v1529_v37 = vmul.f32 %v3627_v29, %v4846_v5  ;;  %v1528_v6 = vmul.f32 %v3626_v49, %v4846_v5  ;;  %v3198_v49 = vld [vmem:[%s4333_s26 + $0xf0] sm:$0xff]  }
 0x131   : > { %v3635_v3 = vpop.permute.xlu1 %3634  ;;  %3488 = vmatmul.mubr.msk.f32.gmra.mrb[46].mxu1 %vm1644_vm2, %v1169_v48  ;;  %v3630_v7 = vpop.permute.xlu0 %3629 }
 0x132   : > { %v3637_v39 = vunpack.i.h.bf16 %v3635_v3  ;;  %v3636_v18 = vunpack.i.l.bf16 %v3635_v3  ;;  %v3632_v11 = vunpack.i.h.bf16 %v3630_v7  ;;  %v3631_v54 = vunpack.i.l.bf16 %v3630_v7  ;;  %3490 = vmatprep.mubr.msk.f32.mxu1 %vm3805_vm9, %v5313_v53 }
 0x133   : > { %v4865_v20 = vadd.f32 %v4859_v13, %v1528_v6  ;;  %v4868_v62 = vadd.f32 %v4859_v13, %v1529_v37 }
 0x134   : > { %v1533_v56 = vmul.f32 %v3637_v39, %v4846_v5  ;;  %v1532_v58 = vmul.f32 %v3636_v18, %v4846_v5  ;;  %v1531_v45 = vmul.f32 %v3632_v11, %v4846_v5  ;;  %v1530_v43 = vmul.f32 %v3631_v54, %v4846_v5 }
 0x135   : > { %v3645_v16 = vpop.permute.xlu1 %3644  ;;  %3491 = vmatmul.mubr.msk.f32.gmra.mrb[48].mxu1 %vm1644_vm2, %v1170_v30  ;;  %v3640_v32 = vpop.permute.xlu0 %3639  ;;  %v3012_v39 = vunpack.c.l.bf16 %v3198_v49 }
 0x136   : > { %v3647_v4 = vunpack.i.h.bf16 %v3645_v16  ;;  %v3646_v61 = vunpack.i.l.bf16 %v3645_v16  ;;  %v3642_v19 = vunpack.i.h.bf16 %v3640_v32  ;;  %v3641_v10 = vunpack.i.l.bf16 %v3640_v32  ;;  %3493 = vmatprep.mubr.msk.f32.mxu1 %vm3805_vm9, %v5313_v53  ;;  %v606_v16 = vld [vmem:[%s4333_s26 + $0xf8] sm:$0xf] }
 0x137   : > { %v4881_v47 = vadd.f32 %v4859_v13, %v1530_v43  ;;  %v4884_v40 = vadd.f32 %v4859_v13, %v1531_v45  ;;  %v4887_v28 = vadd.f32 %v4859_v13, %v1532_v58  ;;  %v4890_v57 = vadd.f32 %v4859_v13, %v1533_v56 }
 0x138   : > { %v1537_v8 = vmul.f32 %v3647_v4, %v4846_v5  ;;  %v1536_v46 = vmul.f32 %v3646_v61, %v4846_v5  ;;  %v1535_v9 = vmul.f32 %v3642_v19, %v4846_v5  ;;  %v1534_v36 = vmul.f32 %v3641_v10, %v4846_v5 }
 0x139   : > { %v3655_v51 = vpop.permute.xlu1 %3654  ;;  %3494 = vmatmul.mubr.msk.f32.gmra.mrb[50].mxu1 %vm1644_vm2, %v1171_v35  ;;  %v3650_v31 = vpop.permute.xlu0 %3649  ;;  %v1111_v45 = vsel %vm672_vm1, 1.0, %v4765_v59  ;;  %v3013_v19 = vunpack.c.h.bf16 %v3198_v49 }
 0x13a   : > { %v3657_v27 = vunpack.i.h.bf16 %v3655_v51  ;;  %v3656_v52 = vunpack.i.l.bf16 %v3655_v51  ;;  %v3652_v24 = vunpack.i.h.bf16 %v3650_v31  ;;  %v3651_v29 = vunpack.i.l.bf16 %v3650_v31  ;;  %3496 = vmatprep.mubr.msk.f32.mxu1 %vm3805_vm9, %v5313_v53 }
 0x13b   : > { %v4904_v48 = vadd.f32 %v4859_v13, %v1534_v36  ;;  %v4907_v33 = vadd.f32 %v4859_v13, %v1535_v9  ;;  %v4910_v22 = vadd.f32 %v4859_v13, %v1536_v46  ;;  %v4913_v21 = vadd.f32 %v4859_v13, %v1537_v8 }
 0x13c   : > { %v1541_v37 = vmul.f32 %v3657_v27, %v4846_v5  ;;  %v1540_v6 = vmul.f32 %v3656_v52, %v4846_v5  ;;  %v1539_v26 = vmul.f32 %v3652_v24, %v4846_v5  ;;  %v1538_v14 = vmul.f32 %v3651_v29, %v4846_v5 }
 0x13d   : > { %v4919_v3 = vpop.permute.xlu1 %3664  ;;  %3497 = vmatmul.mubr.msk.f32.gmra.mrb[52].mxu1 %vm1644_vm2, %v1172_v25  ;;  %v3660_v7 = vpop.permute.xlu0 %3659  ;;  %v1174_v61 = vmul.f32 %v3012_v39, %v1111_v45  ;;  %v1112_v8 = vsel %vm672_vm1, 1.0, %v4778_v12  ;;  %v669_v36 = vunpack.c.l.bf16 %v606_v16  ;;  %v1113_v25 = vsel %vm672_vm1, 1.0, %v4794_v38 }
 0x13e   : > { %v3662_v18 = vunpack.i.h.bf16 %v3660_v7  ;;  %v3661_v11 = vunpack.i.l.bf16 %v3660_v7  ;;  %3499 = vmatprep.mubr.msk.f32.mxu1 %vm3805_vm9, %v5313_v53  ;;  %v4925_v54 = vadd.f32 %v4859_v13, %v1538_v14  ;;  %v4928_v30 = vadd.f32 %v4859_v13, %v1539_v26 }
 0x13f   : > { %v4931_v56 = vadd.f32 %v4859_v13, %v1540_v6  ;;  %v4934_v58 = vadd.f32 %v4859_v13, %v1541_v37  ;;  %v1175_v12 = vmul.f32 %v3013_v19, %v1112_v8  ;;  %v1176_v6 = vmul.f32 %v1113_v25, %v669_v36 }
 0x140   : > { %v1543_v43 = vmul.f32 %v3662_v18, %v4846_v5  ;;  %v1542_v35 = vmul.f32 %v3661_v11, %v4846_v5 }
 0x141   : > { %v3675_v41 = vpop.permute.xlu1 %3674  ;;  %3500 = vmatmul.mubr.msk.f32.gmra.mrb[54].mxu1 %vm1644_vm2, %v1173_v63  ;;  %v4942_v0 = vpop.permute.xlu0 %3669 }
 0x142   : > { %v3677_v32 = vunpack.i.h.bf16 %v3675_v41  ;;  %v3676_v4 = vunpack.i.l.bf16 %v3675_v41  ;;  %3502 = vmatprep.mubr.msk.f32.mxu1 %vm3805_vm9, %v5313_v53  ;;  %v4948_v10 = vadd.f32 %v4859_v13, %v1542_v35  ;;  %v4951_v59 = vadd.f32 %v4859_v13, %v1543_v43 }
 0x144   : > { %v1549_v46 = vmul.f32 %v3677_v32, %v4846_v5  ;;  %v1548_v9 = vmul.f32 %v3676_v4, %v4846_v5 }
 0x145   : > { %v3685_v34 = vpop.permute.xlu1 %3684  ;;  %3503 = vmatmul.mubr.msk.f32.gmra.mrb[56].mxu1 %vm1644_vm2, %v1174_v61  ;;  %v3680_v44 = vpop.permute.xlu0 %3679 }
 0x146   : > { %v3687_v51 = vunpack.i.h.bf16 %v3685_v34  ;;  %v3686_v31 = vunpack.i.l.bf16 %v3685_v34  ;;  %v3682_v27 = vunpack.i.h.bf16 %v3680_v44  ;;  %v3681_v52 = vunpack.i.l.bf16 %v3680_v44  ;;  %3505 = vmatprep.mubr.msk.f32.mxu1 %vm3805_vm9, %v5313_v53 }
 0x147   : > { %v4965_v24 = vadd.f32 %v4859_v13, %v1548_v9  ;;  %v4968_v29 = vadd.f32 %v4859_v13, %v1549_v46 }
 0x148   : > { %v1553_v23 = vmul.f32 %v3687_v51, %v4846_v5  ;;  %v1552_v38 = vmul.f32 %v3686_v31, %v4846_v5  ;;  %v1551_v49 = vmul.f32 %v3682_v27, %v4846_v5  ;;  %v1550_v37 = vmul.f32 %v3681_v52, %v4846_v5 }
 0x149   : > { %v3695_v26 = vpop.permute.xlu1 %3694  ;;  %3506 = vmatmul.mubr.msk.f32.gmra.mrb[58].mxu1 %vm1644_vm2, %v1175_v12  ;;  %v3690_v14 = vpop.permute.xlu0 %3689 }
 0x14a   : > { %v3697_v7 = vunpack.i.h.bf16 %v3695_v26  ;;  %v3696_v63 = vunpack.i.l.bf16 %v3695_v26  ;;  %v3692_v39 = vunpack.i.h.bf16 %v3690_v14  ;;  %v3691_v18 = vunpack.i.l.bf16 %v3690_v14  ;;  %3508 = vmatprep.mubr.msk.f32.mxu1 %vm3805_vm9, %v5313_v53 }
 0x14b   : > { %v4978_v11 = vadd.f32 %v4859_v13, %v1550_v37  ;;  %v4981_v45 = vadd.f32 %v4859_v13, %v1551_v49  ;;  %v4984_v43 = vadd.f32 %v4859_v13, %v1552_v38  ;;  %v4987_v35 = vadd.f32 %v4859_v13, %v1553_v23 }
 0x14c   : > { %v1557_v41 = vmul.f32 %v3697_v7, %v4846_v5  ;;  %v1556_v16 = vmul.f32 %v3696_v63, %v4846_v5  ;;  %v1555_v32 = vmul.f32 %v3692_v39, %v4846_v5  ;;  %v1554_v53 = vmul.f32 %v3691_v18, %v4846_v5 }
 0x14d   : > { %v3705_v4 = vpop.permute.xlu1 %3704  ;;  %3509 = vmatmul.mubr.msk.f32.gmra.mrb[60].mxu1 %vm1644_vm2, %v1176_v6  ;;  %v3700_v61 = vpop.permute.xlu0 %3699 }
 0x14e   : > { %v3707_v19 = vunpack.i.h.bf16 %v3705_v4  ;;  %v3706_v8 = vunpack.i.l.bf16 %v3705_v4  ;;  %v3702_v46 = vunpack.i.h.bf16 %v3700_v61  ;;  %v3701_v9 = vunpack.i.l.bf16 %v3700_v61 }
 0x14f   : > { %v4995_v36 = vadd.f32 %v4859_v13, %v1554_v53  ;;  %v4998_v25 = vadd.f32 %v4859_v13, %v1555_v32  ;;  %v5001_v34 = vadd.f32 %v4859_v13, %v1556_v16  ;;  %v5004_v44 = vadd.f32 %v4859_v13, %v1557_v41 }
 0x150   : > { %v1561_v51 = vmul.f32 %v3707_v19, %v4846_v5  ;;  %v1560_v31 = vmul.f32 %v3706_v8, %v4846_v5  ;;  %v1559_v27 = vmul.f32 %v3702_v46, %v4846_v5  ;;  %v1558_v52 = vmul.f32 %v3701_v9, %v4846_v5 }
 0x151   : > { %v3715_v12 = vpop.permute.xlu1 %3714  ;;  %v3710_v23 = vpop.permute.xlu0 %3709 }
 0x152   : > { %v3717_v38 = vunpack.i.h.bf16 %v3715_v12  ;;  %v3716_v49 = vunpack.i.l.bf16 %v3715_v12  ;;  %v3712_v37 = vunpack.i.h.bf16 %v3710_v23  ;;  %v3711_v6 = vunpack.i.l.bf16 %v3710_v23 }
 0x153   : > { %v5011_v26 = vadd.f32 %v4859_v13, %v1558_v52  ;;  %v5014_v14 = vadd.f32 %v4859_v13, %v1559_v27  ;;  %v5017_v7 = vadd.f32 %v4859_v13, %v1560_v31  ;;  %v5020_v63 = vadd.f32 %v4859_v13, %v1561_v51 }
 0x154   : > { %v1565_v39 = vmul.f32 %v3717_v38, %v4846_v5  ;;  %v1564_v18 = vmul.f32 %v3716_v49, %v4846_v5  ;;  %v1563_v41 = vmul.f32 %v3712_v37, %v4846_v5  ;;  %v1562_v16 = vmul.f32 %v3711_v6, %v4846_v5 }
 0x155   : > { %v3725_v32 = vpop.permute.xlu1 %3724  ;;  %v3720_v53 = vpop.permute.xlu0 %3719 }
 0x156   : > { %v3727_v4 = vunpack.i.h.bf16 %v3725_v32  ;;  %v3726_v61 = vunpack.i.l.bf16 %v3725_v32  ;;  %v3722_v19 = vunpack.i.h.bf16 %v3720_v53  ;;  %v3721_v8 = vunpack.i.l.bf16 %v3720_v53 }
 0x157   : > { %v5027_v46 = vadd.f32 %v4859_v13, %v1562_v16  ;;  %v5030_v9 = vadd.f32 %v4859_v13, %v1563_v41  ;;  %v5033_v51 = vadd.f32 %v4859_v13, %v1564_v18  ;;  %v5036_v31 = vadd.f32 %v4859_v13, %v1565_v39 }
 0x158   : > { %v1569_v27 = vmul.f32 %v3727_v4, %v4846_v5  ;;  %v1568_v52 = vmul.f32 %v3726_v61, %v4846_v5  ;;  %v1567_v12 = vmul.f32 %v3722_v19, %v4846_v5  ;;  %v1566_v23 = vmul.f32 %v3721_v8, %v4846_v5 }
 0x159   : > { %v3735_v38 = vpop.permute.xlu1 %3734  ;;  %v3730_v49 = vpop.permute.xlu0 %3729 }
 0x15a   : > { %v3737_v37 = vunpack.i.h.bf16 %v3735_v38  ;;  %v3736_v6 = vunpack.i.l.bf16 %v3735_v38  ;;  %v3732_v41 = vunpack.i.h.bf16 %v3730_v49  ;;  %v3731_v16 = vunpack.i.l.bf16 %v3730_v49 }
 0x15b   : > { %v5043_v18 = vadd.f32 %v4859_v13, %v1566_v23  ;;  %v5046_v39 = vadd.f32 %v4859_v13, %v1567_v12  ;;  %v5049_v32 = vadd.f32 %v4859_v13, %v1568_v52  ;;  %v5052_v53 = vadd.f32 %v4859_v13, %v1569_v27 }
 0x15c   : > { %v1573_v4 = vmul.f32 %v3737_v37, %v4846_v5  ;;  %v1572_v61 = vmul.f32 %v3736_v6, %v4846_v5  ;;  %v1571_v19 = vmul.f32 %v3732_v41, %v4846_v5  ;;  %v1570_v8 = vmul.f32 %v3731_v16, %v4846_v5 }
 0x15d   : > { %5356 = vst [vmem:[#allocation5_spill] sm:$0xff] %v5052_v53  ;;  %v1504_v38 = vpop.permute.xlu0 %1503  ;;  %v3586_v6 = vunpack.i.l.bf16 %v4790_v50  ;;  %v3587_v41 = vunpack.i.h.bf16 %v4790_v50 }
 0x15e   : > { %v1574_v23 = vmul.f32 %v4846_v5, %v1504_v38  ;;  %v5060_v12 = vadd.f32 %v4859_v13, %v1570_v8  ;;  %v5063_v52 = vadd.f32 %v4859_v13, %v1571_v19  ;;  %v5066_v27 = vadd.f32 %v4859_v13, %v1572_v61 }
 0x15f   : > { %v5069_v49 = vadd.f32 %v4859_v13, %v1573_v4  ;;  %v1512_v16 = vmul.f32 %v3586_v6, %v4846_v5  ;;  %v1513_v8 = vmul.f32 %v3587_v41, %v4846_v5  ;;  %v3591_v19 = vunpack.i.l.bf16 %v4807_v15 }
 0x160   : > { %5357 = vst [vmem:[#allocation7_spill] sm:$0xff] %v5060_v12  ;;  %5358 = vst [vmem:[#allocation6_spill] sm:$0xff] %v5063_v52  ;;  %v5072_v37 = vadd.f32 %v4859_v13, %v1574_v23  ;;  %v3592_v4 = vunpack.i.h.bf16 %v4807_v15  ;;  %v3596_v41 = vunpack.i.l.bf16 %v4803_v17 }
 0x161   : > { %5359 = vst [vmem:[#allocation11_spill] sm:$0xff] %v5066_v27  ;;  %5360 = vst [vmem:[#allocation10_spill] sm:$0xff] %v5069_v49  ;;  %v1581_v38 = vadd.f32 %v4859_v13, %v1512_v16  ;;  %v1514_v23 = vmul.f32 %v3591_v19, %v4846_v5 }
 0x162   : > { %5361 = vst [vmem:[#allocation9_spill] sm:$0xff] %v5072_v37  ;;  %v1582_v37 = vadd.f32 %v4859_v13, %v1513_v8  ;;  %v1515_v12 = vmul.f32 %v3592_v4, %v4846_v5  ;;  %v3597_v8 = vunpack.i.h.bf16 %v4803_v17  ;;  %v3602_v17 = vunpack.i.h.bf16 %v4818_v60 }
 0x163   : > { %v1583_v16 = vadd.f32 %v4859_v13, %v1514_v23 }
 0x164   : > { %v1584_v19 = vadd.f32 %v4859_v13, %v1515_v12 }
 0x178   : > { %v1900_v61 = vpop.f32.mrb[0].mxu0 }
 0x179   : > { %v1901_v27 = vadd.f32 %v1900_v61, %v1581_v38  ;;  %v3324_v52 = vpop.f32.mrb[1].mxu0 }
 0x17c   : > { %v1905_v50 = vpop.f32.mrb[2].mxu0 }
 0x17d   : > { %v1906_v49 = vadd.f32 %v1905_v50, %v1582_v37  ;;  %v3327_v6 = vpop.f32.mrb[3].mxu0  ;;  %v1516_v37 = vmul.f32 %v3596_v41, %v4846_v5 }
 0x17f   : > { %v3017_v53 = vpack.c.bf16 %v1906_v49, %v1901_v27  ;;  %v1517_v27 = vmul.f32 %v3597_v8, %v4846_v5  ;;  %v3601_v49 = vunpack.i.l.bf16 %v4818_v60  ;;  %v1585_v6 = vadd.f32 %v4859_v13, %v1516_v37 }
 0x180   : > { %v1910_v38 = vpop.f32.mrb[4].mxu0  ;;  %v3606_v8 = vunpack.i.l.bf16 %v4815_v42  ;;  %v3607_v60 = vunpack.i.h.bf16 %v4815_v42  ;;  %v3612_v42 = vunpack.i.h.bf16 %v4835_v2 }
 0x181   : > { %3018 = vst [vmem:[%s5088_s11] sm:$0xff] %v3017_v53   ;;  %v1911_v15 = vadd.f32 %v1910_v38, %v1583_v16  ;;  %v3330_v52 = vpop.f32.mrb[5].mxu0  ;;  %v1518_v41 = vmul.f32 %v3601_v49, %v4846_v5  ;;  %v1586_v12 = vadd.f32 %v4859_v13, %v1517_v27 }
 0x182   : > { %v1520_v49 = vmul.f32 %v3606_v8, %v4846_v5 }
 0x183   : > { %v1587_v37 = vadd.f32 %v4859_v13, %v1518_v41 }
 0x184   : > { %v1915_v61 = vpop.f32.mrb[6].mxu0  ;;  %v1589_v41 = vadd.f32 %v4859_v13, %v1520_v49  ;;  %v3666_v49 = vunpack.i.l.bf16 %v4919_v3 }
 0x185   : > { %v1916_v50 = vadd.f32 %v1915_v61, %v1584_v19  ;;  %v3333_v4 = vpop.f32.mrb[7].mxu0 }
 0x187   : > { %v3022_v23 = vpack.c.bf16 %v1916_v50, %v1911_v15  ;;  %v1519_v15 = vmul.f32 %v3602_v17, %v4846_v5 }
 0x188   : > { %v1920_v53 = vpop.f32.mrb[8].mxu0 }
 0x189   : > { %3199 = vst [vmem:[%s5088_s11 + $0x8] sm:$0xff] %v3022_v23   ;;  %v1921_v16 = vadd.f32 %v1920_v53, %v1585_v6  ;;  %v3336_v38 = vpop.f32.mrb[9].mxu0  ;;  %v1588_v27 = vadd.f32 %v4859_v13, %v1519_v15 }
 0x18c   : > { %v1925_v52 = vpop.f32.mrb[10].mxu0 }
 0x18d   : > { %v1926_v19 = vadd.f32 %v1925_v52, %v1586_v12  ;;  %v3339_v61 = vpop.f32.mrb[11].mxu0  ;;  %v1521_v52 = vmul.f32 %v3607_v60, %v4846_v5  ;;  %v3616_v60 = vunpack.i.l.bf16 %v4832_v55 }
 0x18f   : > { %v3027_v50 = vpack.c.bf16 %v1926_v19, %v1921_v16  ;;  %v3611_v16 = vunpack.i.l.bf16 %v4835_v2  ;;  %v1590_v15 = vadd.f32 %v4859_v13, %v1521_v52  ;;  %v1524_v52 = vmul.f32 %v3616_v60, %v4846_v5 }
 0x190   : > { %v1930_v4 = vpop.f32.mrb[12].mxu0 }
 0x191   : > { %3200 = vst [vmem:[%s5088_s11 + $0x10] sm:$0xff] %v3027_v50   ;;  %v1931_v23 = vadd.f32 %v1930_v4, %v1587_v37  ;;  %v3342_v6 = vpop.f32.mrb[13].mxu0  ;;  %v1522_v8 = vmul.f32 %v3611_v16, %v4846_v5  ;;  %v3617_v16 = vunpack.i.h.bf16 %v4832_v55 }
 0x194   : > { %v1935_v53 = vpop.f32.mrb[14].mxu0 }
 0x195   : > { %v1936_v38 = vadd.f32 %v1935_v53, %v1588_v27  ;;  %v3345_v12 = vpop.f32.mrb[15].mxu0  ;;  %v1591_v53 = vadd.f32 %v4859_v13, %v1522_v8  ;;  %v1525_v8 = vmul.f32 %v3617_v16, %v4846_v5 }
 0x197   : > { %v3032_v17 = vpack.c.bf16 %v1936_v38, %v1931_v23  ;;  %v1523_v23 = vmul.f32 %v3612_v42, %v4846_v5 }
 0x198   : > { %v1940_v19 = vpop.f32.mrb[16].mxu0 }
 0x199   : > { %3201 = vst [vmem:[%s5088_s11 + $0x18] sm:$0xff] %v3032_v17   ;;  %v1941_v61 = vadd.f32 %v1940_v19, %v1589_v41  ;;  %v3348_v50 = vpop.f32.mrb[17].mxu0  ;;  %v3667_v17 = vunpack.i.h.bf16 %v4919_v3  ;;  %v1544_v41 = vmul.f32 %v3666_v49, %v4846_v5  ;;  %v1592_v19 = vadd.f32 %v4859_v13, %v1523_v23 }
 0x19b   : > { %v1545_v55 = vmul.f32 %v3667_v17, %v4846_v5  ;;  %v1613_v3 = vadd.f32 %v4859_v13, %v1544_v41 }
 0x19c   : > { %v1945_v37 = vpop.f32.mrb[18].mxu0 }
 0x19d   : > { %v1946_v4 = vadd.f32 %v1945_v37, %v1590_v15  ;;  %v3351_v6 = vpop.f32.mrb[19].mxu0  ;;  %v3621_v15 = vunpack.i.l.bf16 %v4844_v1  ;;  %v1593_v37 = vadd.f32 %v4859_v13, %v1524_v52  ;;  %v3672_v52 = vunpack.i.h.bf16 %v4942_v0 }
 0x19f   : > { %v3037_v27 = vpack.c.bf16 %v1946_v4, %v1941_v61  ;;  %v3671_v4 = vunpack.i.l.bf16 %v4942_v0  ;;  %v1526_v16 = vmul.f32 %v3621_v15, %v4846_v5  ;;  %v1547_v0 = vmul.f32 %v3672_v52, %v4846_v5 }
 0x1a0   : > { %v1950_v38 = vpop.f32.mrb[20].mxu0 }
 0x1a1   : > { %3202 = vst [vmem:[%s5088_s11 + $0x20] sm:$0xff] %v3037_v27   ;;  %v1951_v12 = vadd.f32 %v1950_v38, %v1591_v53  ;;  %v3354_v2 = vpop.f32.mrb[21].mxu0  ;;  %v1546_v17 = vmul.f32 %v3671_v4, %v4846_v5  ;;  %v1595_v15 = vadd.f32 %v4859_v13, %v1526_v16  ;;  %v1616_v16 = vadd.f32 %v4859_v13, %v1547_v0 }
 0x1a2   : > { %v3622_v2 = vunpack.i.h.bf16 %v4844_v1 }
 0x1a4   : > { %v1955_v50 = vpop.f32.mrb[22].mxu0  ;;  %v1527_v1 = vmul.f32 %v3622_v2, %v4846_v5 }
 0x1a5   : > { %v1956_v42 = vadd.f32 %v1955_v50, %v1592_v19  ;;  %v3357_v61 = vpop.f32.mrb[23].mxu0  ;;  %v1594_v19 = vadd.f32 %v4859_v13, %v1525_v8  ;;  %v1615_v8 = vadd.f32 %v4859_v13, %v1546_v17 }
 0x1a6   : > { %v1596_v2 = vadd.f32 %v4859_v13, %v1527_v1 }
 0x1a7   : > { %v3042_v6 = vpack.c.bf16 %v1956_v42, %v1951_v12  ;;  %v1614_v12 = vadd.f32 %v4859_v13, %v1545_v55 }
 0x1a8   : > { %v1960_v60 = vpop.f32.mrb[24].mxu0  ;;  %v2060_v49 = vpop.f32.mrb[0].mxu1 }
 0x1a9   : > { %3203 = vst [vmem:[%s5088_s11 + $0x28] sm:$0xff] %v3042_v6   ;;  %v1961_v23 = vadd.f32 %v1960_v60, %v1593_v37  ;;  %v2061_v27 = vadd.f32 %v2060_v49, %v1613_v3  ;;  %v3360_v53 = vpop.f32.mrb[25].mxu0  ;;  %v3420_v38 = vpop.f32.mrb[1].mxu1 }
 0x1ac   : > { %v1965_v41 = vpop.f32.mrb[26].mxu0  ;;  %v2065_v50 = vpop.f32.mrb[2].mxu1 }
 0x1ad   : > { %v1966_v42 = vadd.f32 %v1965_v41, %v1594_v19  ;;  %v2066_v61 = vadd.f32 %v2065_v50, %v1614_v12  ;;  %v3363_v37 = vpop.f32.mrb[27].mxu0  ;;  %v3423_v6 = vpop.f32.mrb[3].mxu1 }
 0x1af   : > { %v3047_v3 = vpack.c.bf16 %v1966_v42, %v1961_v23  ;;  %v3097_v4 = vpack.c.bf16 %v2066_v61, %v2061_v27 }
 0x1b0   : > { %v1970_v60 = vpop.f32.mrb[28].mxu0  ;;  %v2070_v49 = vpop.f32.mrb[4].mxu1 }
 0x1b1   : > { %3204 = vst [vmem:[%s5088_s11 + $0x30] sm:$0xff] %v3047_v3   ;;  %3214 = vst [vmem:[%s5088_s11 + $0x80] sm:$0xff] %v3097_v4   ;;  %v1971_v55 = vadd.f32 %v1970_v60, %v1595_v15  ;;  %v2071_v53 = vadd.f32 %v2070_v49, %v1615_v8  ;;  %v3366_v38 = vpop.f32.mrb[29].mxu0  ;;  %v3426_v19 = vpop.f32.mrb[5].mxu1 }
 0x1b4   : > { %v1975_v12 = vpop.f32.mrb[30].mxu0  ;;  %v2075_v5 = vpop.f32.mrb[6].mxu1 }
 0x1b5   : > { %v1976_v23 = vadd.f32 %v1975_v12, %v1596_v2  ;;  %v2076_v27 = vadd.f32 %v2075_v5, %v1616_v16  ;;  %v3369_v52 = vpop.f32.mrb[31].mxu0  ;;  %v3429_v17 = vpop.f32.mrb[7].mxu1 }
 0x1b7   : > { %v3052_v41 = vpack.c.bf16 %v1976_v23, %v1971_v55  ;;  %v3102_v50 = vpack.c.bf16 %v2076_v27, %v2071_v53 }
 0x1b8   : > { %v1980_v42 = vpop.f32.mrb[32].mxu0  ;;  %v2080_v61 = vpop.f32.mrb[8].mxu1 }
 0x1b9   : > { %3205 = vst [vmem:[%s5088_s11 + $0x38] sm:$0xff] %v3052_v41   ;;  %3215 = vst [vmem:[%s5088_s11 + $0x88] sm:$0xff] %v3102_v50   ;;  %v1981_v37 = vadd.f32 %v1980_v42, %v4865_v20  ;;  %v2081_v6 = vadd.f32 %v2080_v61, %v4965_v24  ;;  %v3372_v1 = vpop.f32.mrb[33].mxu0  ;;  %v3432_v13 = vpop.f32.mrb[9].mxu1 }
 0x1bc   : > { %v1985_v15 = vpop.f32.mrb[34].mxu0  ;;  %v2085_v0 = vpop.f32.mrb[10].mxu1 }
 0x1bd   : > { %v1986_v3 = vadd.f32 %v1985_v15, %v4868_v62  ;;  %v2086_v4 = vadd.f32 %v2085_v0, %v4968_v29  ;;  %v3375_v8 = vpop.f32.mrb[35].mxu0  ;;  %v3435_v60 = vpop.f32.mrb[11].mxu1 }
 0x1bf   : > { %v3057_v49 = vpack.c.bf16 %v1986_v3, %v1981_v37  ;;  %v3107_v55 = vpack.c.bf16 %v2086_v4, %v2081_v6 }
 0x1c0   : > { %v1990_v53 = vpop.f32.mrb[36].mxu0  ;;  %v2090_v38 = vpop.f32.mrb[12].mxu1 }
 0x1c1   : > { %3206 = vst [vmem:[%s5088_s11 + $0x40] sm:$0xff] %v3057_v49   ;;  %3216 = vst [vmem:[%s5088_s11 + $0x90] sm:$0xff] %v3107_v55   ;;  %v1991_v20 = vadd.f32 %v1990_v53, %v4881_v47  ;;  %v2091_v24 = vadd.f32 %v2090_v38, %v4978_v11  ;;  %v3378_v19 = vpop.f32.mrb[37].mxu0  ;;  %v3438_v2 = vpop.f32.mrb[13].mxu1 }
 0x1c4   : > { %v1995_v16 = vpop.f32.mrb[38].mxu0  ;;  %v2095_v62 = vpop.f32.mrb[14].mxu1 }
 0x1c5   : > { %v1996_v29 = vadd.f32 %v1995_v16, %v4884_v40  ;;  %v2096_v12 = vadd.f32 %v2095_v62, %v4981_v45  ;;  %v3381_v5 = vpop.f32.mrb[39].mxu0  ;;  %v3441_v23 = vpop.f32.mrb[15].mxu1 }
 0x1c7   : > { %v3062_v27 = vpack.c.bf16 %v1996_v29, %v1991_v20  ;;  %v3112_v52 = vpack.c.bf16 %v2096_v12, %v2091_v24 }
 0x1c8   : > { %v2000_v17 = vpop.f32.mrb[40].mxu0  ;;  %v2100_v41 = vpop.f32.mrb[16].mxu1 }
 0x1c9   : > { %3207 = vst [vmem:[%s5088_s11 + $0x48] sm:$0xff] %v3062_v27   ;;  %3217 = vst [vmem:[%s5088_s11 + $0x98] sm:$0xff] %v3112_v52   ;;  %v2001_v47 = vadd.f32 %v2000_v17, %v4887_v28  ;;  %v2101_v11 = vadd.f32 %v2100_v41, %v4984_v43  ;;  %v3384_v50 = vpop.f32.mrb[41].mxu0  ;;  %v3444_v42 = vpop.f32.mrb[17].mxu1 }
 0x1cc   : > { %v2005_v61 = vpop.f32.mrb[42].mxu0  ;;  %v2105_v40 = vpop.f32.mrb[18].mxu1 }
 0x1cd   : > { %v2006_v45 = vadd.f32 %v2005_v61, %v4890_v57  ;;  %v2106_v37 = vadd.f32 %v2105_v40, %v4987_v35  ;;  %v3387_v6 = vpop.f32.mrb[43].mxu0  ;;  %v3447_v1 = vpop.f32.mrb[19].mxu1 }
 0x1cf   : > { %v3067_v13 = vpack.c.bf16 %v2006_v45, %v2001_v47  ;;  %v3117_v15 = vpack.c.bf16 %v2106_v37, %v2101_v11 }
 0x1d0   : > { %v2010_v0 = vpop.f32.mrb[44].mxu0  ;;  %v2110_v3 = vpop.f32.mrb[20].mxu1 }
 0x1d1   : > { %3208 = vst [vmem:[%s5088_s11 + $0x50] sm:$0xff] %v3067_v13   ;;  %3218 = vst [vmem:[%s5088_s11 + $0xa0] sm:$0xff] %v3117_v15   ;;  %v2011_v28 = vadd.f32 %v2010_v0, %v4904_v48  ;;  %v2111_v43 = vadd.f32 %v2110_v3, %v4995_v36  ;;  %v3390_v4 = vpop.f32.mrb[45].mxu0  ;;  %v3450_v8 = vpop.f32.mrb[21].mxu1 }
 0x1d4   : > { %v2015_v60 = vpop.f32.mrb[46].mxu0  ;;  %v2115_v57 = vpop.f32.mrb[22].mxu1 }
 0x1d5   : > { %v2016_v35 = vadd.f32 %v2015_v60, %v4907_v33  ;;  %v2116_v49 = vadd.f32 %v2115_v57, %v4998_v25  ;;  %v3393_v55 = vpop.f32.mrb[47].mxu0  ;;  %v3453_v53 = vpop.f32.mrb[23].mxu1 }
 0x1d7   : > { %v3072_v38 = vpack.c.bf16 %v2016_v35, %v2011_v28  ;;  %v3122_v20 = vpack.c.bf16 %v2116_v49, %v2111_v43 }
 0x1d8   : > { %v2020_v24 = vpop.f32.mrb[48].mxu0  ;;  %v2120_v19 = vpop.f32.mrb[24].mxu1 }
 0x1d9   : > { %3209 = vst [vmem:[%s5088_s11 + $0x58] sm:$0xff] %v3072_v38   ;;  %3219 = vst [vmem:[%s5088_s11 + $0xa8] sm:$0xff] %v3122_v20   ;;  %v2021_v48 = vadd.f32 %v2020_v24, %v4910_v22  ;;  %v2121_v36 = vadd.f32 %v2120_v19, %v5001_v34  ;;  %v3396_v2 = vpop.f32.mrb[49].mxu0  ;;  %v3456_v16 = vpop.f32.mrb[25].mxu1 }
 0x1dc   : > { %v2025_v62 = vpop.f32.mrb[50].mxu0  ;;  %v2125_v33 = vpop.f32.mrb[26].mxu1 }
 0x1dd   : > { %v2026_v25 = vadd.f32 %v2025_v62, %v4913_v21  ;;  %v2126_v29 = vadd.f32 %v2125_v33, %v5004_v44  ;;  %v3399_v12 = vpop.f32.mrb[51].mxu0  ;;  %v3459_v5 = vpop.f32.mrb[27].mxu1 }
 0x1df   : > { %v3077_v23 = vpack.c.bf16 %v2026_v25, %v2021_v48  ;;  %v3127_v27 = vpack.c.bf16 %v2126_v29, %v2121_v36 }
 0x1e0   : > { %v2030_v52 = vpop.f32.mrb[52].mxu0  ;;  %v2130_v17 = vpop.f32.mrb[28].mxu1 }
 0x1e1   : > { %3210 = vst [vmem:[%s5088_s11 + $0x60] sm:$0xff] %v3077_v23   ;;  %3220 = vst [vmem:[%s5088_s11 + $0xb0] sm:$0xff] %v3127_v27   ;;  %v2031_v22 = vadd.f32 %v2030_v52, %v4925_v54  ;;  %v2131_v34 = vadd.f32 %v2130_v17, %v5011_v26  ;;  %v3402_v41 = vpop.f32.mrb[53].mxu0  ;;  %v3462_v47 = vpop.f32.mrb[29].mxu1  ;;  %v5362_v27 = vld [vmem:[#allocation5_spill] sm:$0xff] }
 0x1e4   : > { %v2035_v11 = vpop.f32.mrb[54].mxu0  ;;  %v2135_v21 = vpop.f32.mrb[30].mxu1 }
 0x1e5   : > { %v2036_v44 = vadd.f32 %v2035_v11, %v4928_v30  ;;  %v2136_v50 = vadd.f32 %v2135_v21, %v5014_v14  ;;  %v3405_v42 = vpop.f32.mrb[55].mxu0  ;;  %v3465_v61 = vpop.f32.mrb[31].mxu1  ;;  %v5364_v11 = vld [vmem:[#allocation6_spill] sm:$0xff] }
 0x1e6   : > { %v5365_v42 = vld [vmem:[#allocation11_spill] sm:$0xff] }
 0x1e7   : > { %v3082_v40 = vpack.c.bf16 %v2036_v44, %v2031_v22  ;;  %v3132_v45 = vpack.c.bf16 %v2136_v50, %v2131_v34 }
 0x1e8   : > { %v2040_v37 = vpop.f32.mrb[56].mxu0  ;;  %v2140_v6 = vpop.f32.mrb[32].mxu1 }
 0x1e9   : > { %3211 = vst [vmem:[%s5088_s11 + $0x68] sm:$0xff] %v3082_v40   ;;  %3221 = vst [vmem:[%s5088_s11 + $0xb8] sm:$0xff] %v3132_v45   ;;  %v2041_v54 = vadd.f32 %v2040_v37, %v4931_v56  ;;  %v2141_v26 = vadd.f32 %v2140_v6, %v5017_v7  ;;  %v3408_v1 = vpop.f32.mrb[57].mxu0  ;;  %v3468_v13 = vpop.f32.mrb[33].mxu1  ;;  %v5366_v37 = vld [vmem:[#allocation10_spill] sm:$0xff] }
 0x1ea   : > { %v5367_v13 = vld [vmem:[#allocation9_spill] sm:$0xff] }
 0x1ec   : > { %v2045_v15 = vpop.f32.mrb[58].mxu0  ;;  %v2145_v30 = vpop.f32.mrb[34].mxu1 }
 0x1ed   : > { %v2046_v14 = vadd.f32 %v2045_v15, %v4934_v58  ;;  %v2146_v0 = vadd.f32 %v2145_v30, %v5020_v63  ;;  %v3411_v3 = vpop.f32.mrb[59].mxu0  ;;  %v3471_v28 = vpop.f32.mrb[35].mxu1 }
 0x1ef   : > { %v3087_v43 = vpack.c.bf16 %v2046_v14, %v2041_v54  ;;  %v3137_v4 = vpack.c.bf16 %v2146_v0, %v2141_v26 }
 0x1f0   : > { %v2050_v8 = vpop.f32.mrb[60].mxu0  ;;  %v2150_v60 = vpop.f32.mrb[36].mxu1 }
 0x1f1   : > { %3212 = vst [vmem:[%s5088_s11 + $0x70] sm:$0xff] %v3087_v43   ;;  %3222 = vst [vmem:[%s5088_s11 + $0xc0] sm:$0xff] %v3137_v4   ;;  %v2051_v56 = vadd.f32 %v2050_v8, %v4948_v10  ;;  %v2151_v7 = vadd.f32 %v2150_v60, %v5027_v46  ;;  %v3414_v57 = vpop.f32.mrb[61].mxu0  ;;  %v3474_v35 = vpop.f32.mrb[37].mxu1 }
 0x1f4   : > { %v2055_v49 = vpop.f32.mrb[62].mxu0  ;;  %v2155_v58 = vpop.f32.mrb[38].mxu1 }
 0x1f5   : > { %v2056_v63 = vadd.f32 %v2055_v49, %v4951_v59  ;;  %v2156_v55 = vadd.f32 %v2155_v58, %v5030_v9  ;;  %v3417_v53 = vpop.f32.mrb[63].mxu0  ;;  %v3477_v38 = vpop.f32.mrb[39].mxu1 }
 0x1f7   : > { %v3092_v20 = vpack.c.bf16 %v2056_v63, %v2051_v56  ;;  %v3142_v24 = vpack.c.bf16 %v2156_v55, %v2151_v7 }
 0x1f8   : > { %v2160_v19 = vpop.f32.mrb[40].mxu1 }
 0x1f9   : > { %3213 = vst [vmem:[%s5088_s11 + $0x78] sm:$0xff] %v3092_v20   ;;  %3223 = vst [vmem:[%s5088_s11 + $0xc8] sm:$0xff] %v3142_v24   ;;  %v2161_v10 = vadd.f32 %v2160_v19, %v5033_v51  ;;  %v3480_v46 = vpop.f32.mrb[41].mxu1 }
 0x1fc   : > { %v2165_v48 = vpop.f32.mrb[42].mxu1 }
 0x1fd   : > { %v2166_v36 = vadd.f32 %v2165_v48, %v5036_v31  ;;  %v3483_v2 = vpop.f32.mrb[43].mxu1 }
 0x1ff   : > { %v3147_v16 = vpack.c.bf16 %v2166_v36, %v2161_v10 }
 0x200   : > { %v2170_v59 = vpop.f32.mrb[44].mxu1 }
 0x201   : > { %3224 = vst [vmem:[%s5088_s11 + $0xd0] sm:$0xff] %v3147_v16   ;;  %v2171_v9 = vadd.f32 %v2170_v59, %v5043_v18  ;;  %v3486_v62 = vpop.f32.mrb[45].mxu1  ;;  %v5363_v18 = vld [vmem:[#allocation7_spill] sm:$0xff] }
 0x204   : > { %v2175_v33 = vpop.f32.mrb[46].mxu1 }
 0x205   : > { %v2176_v25 = vadd.f32 %v2175_v33, %v5046_v39  ;;  %v3489_v29 = vpop.f32.mrb[47].mxu1 }
 0x207   : > { %v3152_v12 = vpack.c.bf16 %v2176_v25, %v2171_v9 }
 0x208   : > { %v2180_v5 = vpop.f32.mrb[48].mxu1 }
 0x209   : > { %3225 = vst [vmem:[%s5088_s11 + $0xd8] sm:$0xff] %v3152_v12   ;;  %v2181_v51 = vadd.f32 %v2180_v5, %v5049_v32  ;;  %v3492_v23 = vpop.f32.mrb[49].mxu1 }
 0x20c   : > { %v2185_v31 = vpop.f32.mrb[50].mxu1 }
 0x20d   : > { %v2186_v52 = vadd.f32 %v2185_v31, %v5362_v27  ;;  %v3495_v17 = vpop.f32.mrb[51].mxu1 }
 0x20f   : > { %v3157_v22 = vpack.c.bf16 %v2186_v52, %v2181_v51 }
 0x210   : > { %v2190_v34 = vpop.f32.mrb[52].mxu1 }
 0x211   : > { %3226 = vst [vmem:[%s5088_s11 + $0xe0] sm:$0xff] %v3157_v22   ;;  %v2191_v41 = vadd.f32 %v2190_v34, %v5363_v18  ;;  %v3498_v47 = vpop.f32.mrb[53].mxu1 }
 0x214   : > { %v2195_v39 = vpop.f32.mrb[54].mxu1 }
 0x215   : > { %v2196_v21 = vadd.f32 %v2195_v39, %v5364_v11  ;;  %v3501_v44 = vpop.f32.mrb[55].mxu1 }
 0x217   : > { %v3162_v50 = vpack.c.bf16 %v2196_v21, %v2191_v41 }
 0x218   : > { %v2200_v32 = vpop.f32.mrb[56].mxu1 }
 0x219   : > { %3227 = vst [vmem:[%s5088_s11 + $0xe8] sm:$0xff] %v3162_v50   ;;  %v2201_v61 = vadd.f32 %v2200_v32, %v5365_v42  ;;  %v3504_v40 = vpop.f32.mrb[57].mxu1 }
 0x21c   : > { %v2205_v45 = vpop.f32.mrb[58].mxu1 }
 0x21d   : > { %v2206_v6 = vadd.f32 %v2205_v45, %v5366_v37  ;;  %v3507_v54 = vpop.f32.mrb[59].mxu1 }
 0x21f   : > { %v3167_v26 = vpack.c.bf16 %v2206_v6, %v2201_v61  ;;  %2537 = sbr.rel (!%p3877_p5) target bundleno = 578 (0x242), region = 44 }
 0x220   : > { %v2210_v1 = vpop.f32.mrb[60].mxu1 }
 0x221   : > { %3228 = vst [vmem:[%s5088_s11 + $0xf0] sm:$0xff] %v3167_v26   ;;  %v2211_v15 = vadd.f32 %v2210_v1, %v5367_v13  ;;  %v3510_v30 = vpop.f32.mrb[61].mxu1 }
 0x223   : > { %v2888_v14 = vpack.c.bf16 %v2211_v15, %v2211_v15 }
 0x225   : > { %2529 = vst [vmem:[%s5088_s11 + $0xf8] sm:$0xf] %v2888_v14 }
 0x226   : > { %s5373_s13 = smov (!%p2540_p11, %s2539_s13), 63 }
 0x227   : > { %s5220_s15 = sshll.u32 %s5373_s13, 6 }
 0x228   : > { %s2544_s16 = ssub.s32 4032, %s5220_s15 }
 0x229   : > { %2545 = vsyncadd %s5215_s12, %s2544_s16  ;;  %p2820_p12 = scmp.ne.s32.totalorder %s5220_s15, 0  ;;  %s2889_s17 = smul.u32 4032, %s3860_s22 }
 0x22a   : > { %s2550_s23 = sshll.u32 %s5088_s11, 4  ;;  %s3806_s14 = smov [#allocation2]   ;;  %s5232_s23 = int_to_ptr.vmem [resolvable:$true] %s2550_s23 }
 0x22b   : > { %s5230_s26 = scalar_lea.hbm %s5281_s5, %s2889_s17  ;;  %s3738_s30 = scalar_lea.vmem %s5232_s23, %s5220_s15 }
 0x22c   : > { %p3739_p13 = scmp.ne.s32.totalorder %s5232_s23, %s3738_s30  ;;  %s3742_s6 = sshll.u32 %s3806_s14, 4  ;;  %s3743_s6 = int_to_ptr.vmem [resolvable:$false] %s3742_s6 }
 0x22d   : > { %s3744_s22 = scalar_lea.vmem %s3743_s6, 8064  ;;  %p3745_p2 = scmp.lt.s32.totalorder %s5232_s23, %s3743_s6 }
 0x22e   : > { %p3740_p0 = pnand %p3739_p13, %p2820_p12  ;;  %p3746_p3 = scmp.lt.s32.totalorder %s3744_s22, %s3738_s30 }
 0x230   : > { %p3741_p1 = pneg %p3740_p0  ;;  %p3747_p4 = por %p3746_p3, %p3745_p2 }
 0x232   : > { %p3748_p5 = pnand %p3747_p4, %p3741_p1 }
 0x234   : > { %3751 = shalt.err (!%p3748_p5)
}
 0x235   : > { %s3752_s7 = scalar_lea.hbm %s5230_s26, %s5220_s15  ;;  %s3756_s10 = scalar_lea.hbm %s5281_s5, 8000 }
 0x236   : > { %p3753_p7 = scmp.ne.s32.totalorder %s5230_s26, %s3752_s7  ;;  %p3757_p10 = scmp.lt.u32.totalorder %s5230_s26, %s5281_s5 }
 0x237   : > { %p3758_p11 = scmp.lt.u32.totalorder %s3756_s10, %s3752_s7  ;;  %p3760_p0 = scmp.lt.u32.totalorder %s3752_s7, %s5230_s26 }
 0x238   : > { %p3754_p8 = pnand %p3753_p7, %p2820_p12 }
 0x239   : > { %p3759_p13 = por %p3758_p11, %p3757_p10 }
 0x23a   : > { %p3755_p9 = pneg %p3754_p8 }
 0x23b   : > { %p3761_p1 = por %p3760_p0, %p3759_p13 }
 0x23d   : > { %p3762_p2 = pnand %p3761_p1, %p3755_p9 }
 0x23f   : > { %3765 = shalt.err (!%p3762_p2)
}
 0x240   : > { %s3807_s16 = smov 64   ;;  %s3808_s17 = smov 4  }
 0x241   : > { %2556 = dma.vmem_to_hbm [thread:$0]  (%p2820_p12), %s5232_s23, %s5220_s15, %s5230_s26, %s5215_s12, %s3807_s16, %s3807_s16, %s3808_s17  }
 0x242 PF: > { %p3542_p3 = scmp.ge.s32.totalorder %s3800_s21, 2  ;;  %s2565_s28 = sand.u32 1, %s3788_s18  }
 0x243   : > { %s2566_s25 = scalar_lea.sflag [#allocation3], %s2565_s28 }
 0x244   : > { %p3539_p4 = pnand %p3542_p3, %p3881_p6 }
 0x246   : > { %3783 = dma.done.wait (!%p3539_p4), %s2566_s25, 4032  }
 0x247   : > { %3785 = vsyncadd (!%p3539_p4), %s2566_s25, 4294963264  ;;  %p15_p5 = scmp.ge.s32.totalorder %s3864_s24, 4   ;;  %s5368_s18 = smov %s3792_s19 }
 0x248   : > { %s5369_s19 = smov %s3796_s20  ;;  %s5370_s20 = smov %s3875_s27 }
 0x249   : > { %s5371_s21 = smov %s3864_s24  ;;  %17 = sbr.rel (!%p15_p5) target bundleno = 3 (0x3), region = 78 }
 0x250   :  { %2571 = vsyncpa [#allocation3], 1 }
 0x251   :  { %2573 = vsyncpa [#allocation3 + $0x1], 1 }

</bundles_post_ra>
